<compile_context>
chip_gen: v7x
topology: tpu7x:2x2x1
jax: 0.10.0
libtpu: 0.0.40
codegen_flags: <defaults>
</compile_context>

<pallas_src>
import functools

import jax
import jax.numpy as jnp
from jax.experimental import pallas as pl
from jax.experimental.pallas import tpu as pltpu


TILE = 128       # row tile (lane/MXU aligned on v5e/v6e/v7x; use 256 on v6e/v7x for huge graphs)
FEAT_PAD = 128   # padded feature / hidden width (lane dimension)


def _round_up(v, m):
    return ((v + m - 1) // m) * m


# ----------------------------- Fused Pallas kernel ------------------------------

def _hon_fused_kernel(adj_ref, x_ref, w1_ref, b1_ref, w2_ref, b2_ref,
                      sim_ref, h_ping, h_pong, *, num_layers, tile, eps):
    """Grid = (phase, row_tile).

    Phase p < num_layers : GIN layer p for this row tile
        h_out[rows] = ReLU(ReLU(((1+eps)*h_in[rows] + A[rows,:] @ h_in) @ W1 + b1) @ W2 + b2)
    Phase p == num_layers: cosine-similarity row tile
        sim[rows, :] = norm(h)[rows] @ norm(h)^T
    h_ping holds the (full) layer input / normalized features, h_pong the layer output;
    both persist in VMEM across the whole grid, so intermediates never touch HBM.
    """
    p = pl.program_id(0)
    i = pl.program_id(1)
    last = num_layers

    row0 = pl.multiple_of(i * tile, tile)
    rows = pl.ds(row0, tile)

    # ---- per-phase staging (first row tile of every phase) ----
    @pl.when((i == 0) & (p == 0))
    def _load_x():
        h_ping[...] = x_ref[...]

    @pl.when((i == 0) & (p > 0) & (p < last))
    def _advance_layer():
        h_ping[...] = h_pong[...]

    @pl.when((i == 0) & (p == last))
    def _normalize():
        h = h_pong[...]
        inv = jax.lax.rsqrt(jnp.sum(h * h, axis=-1, keepdims=True) + 1e-12)
        h_ping[...] = h * inv

    # ---- GIN layer for this row tile ----
    @pl.when(p < last)
    def _gin():
        h_prev = h_ping[...]                       # full [N_pad, H] f32 (layer input)
        h_rows = h_ping[rows, :]
        if eps != 0.0:                              # compile-time skip when eps == 0
            h_rows = (1.0 + eps) * h_rows
        agg = h_rows + jnp.dot(adj_ref[...],        # bf16 adjacency row tile
                               h_prev.astype(jnp.bfloat16),
                               preferred_element_type=jnp.float32)
        h1 = jnp.maximum(
            jnp.dot(agg, w1_ref[0], preferred_element_type=jnp.float32) + b1_ref[0], 0.0)
        h2 = jnp.maximum(
            jnp.dot(h1, w2_ref[0], preferred_element_type=jnp.float32) + b2_ref[0], 0.0)
        h_pong[rows, :] = h2

    # ---- cosine-similarity row tile (lane-dense [tile, N_pad] output) ----
    @pl.when(p == last)
    def _sim():
        hn_rows = h_ping[rows, :]
        sim_ref[...] = jax.lax.dot_general(
            hn_rows, h_ping[...],
            dimension_numbers=(((1,), (1,)), ((), ())),   # NT matmul, no transpose copy
            preferred_element_type=jnp.float32)


def _hon_fused_call(adj, x_pad, w1s, b1s, w2s, b2s, *, num_layers, tile=TILE, eps=0.0):
    n_pad, h_pad = x_pad.shape
    assert n_pad % tile == 0
    num_tiles = n_pad // tile
    last = num_layers

    kernel = functools.partial(_hon_fused_kernel, num_layers=num_layers, tile=tile, eps=eps)
    layer_idx = lambda p, i: (jnp.minimum(p, last - 1), 0, 0)   # weights resident per phase

    return pl.pallas_call(
        kernel,
        out_shape=jax.ShapeDtypeStruct((n_pad, n_pad), jnp.float32),
        grid_spec=pltpu.PrefetchScalarGridSpec(
            num_scalar_prefetch=0,
            grid=(num_layers + 1, num_tiles),
            in_specs=[
                # adjacency row tile; only streamed during the GIN phases
                pl.BlockSpec((tile, n_pad), lambda p, i: (jnp.where(p < last, i, 0), 0)),
                # node features: whole (padded) array resident in VMEM, DMA'd once
                pl.BlockSpec((n_pad, h_pad), lambda p, i: (0, 0)),
                # stacked per-layer weights/biases: one layer resident at a time
                pl.BlockSpec((1, h_pad, h_pad), layer_idx),
                pl.BlockSpec((1, 1, h_pad), layer_idx),
                pl.BlockSpec((1, h_pad, h_pad), layer_idx),
                pl.BlockSpec((1, 1, h_pad), layer_idx),
            ],
            # The sim output block only "moves" during the final phase, so each HBM block is
            # written exactly once (no garbage flushes during the GIN phases).
            out_specs=pl.BlockSpec((tile, n_pad),
                                   lambda p, i: (jnp.where(p == last, i, 0), 0)),
            scratch_shapes=[
                pltpu.VMEM((n_pad, h_pad), jnp.float32),   # h_ping: layer input / normalized h
                pltpu.VMEM((n_pad, h_pad), jnp.float32),   # h_pong: layer output
            ],
        ),
        compiler_params=pltpu.CompilerParams(
            # Row tiles depend on scratch written at i == 0 of each phase -> sequential grid.
            dimension_semantics=("arbitrary", "arbitrary"),
            vmem_limit_bytes=32 * 1024 * 1024,
        ),
    )(adj, x_pad, w1s, b1s, w2s, b2s)


# ------------------------------ Model wrapper ------------------------------

def init_gin_params(key, in_dim, hidden_dim, num_layers):
    params = []
    dims = [in_dim] + [hidden_dim] * num_layers
    for layer in range(num_layers):
        k1, k2, key = jax.random.split(key, 3)
        d_in, d_out = dims[layer], dims[layer + 1]
        w1 = jax.random.normal(k1, (d_in, d_out), jnp.float32) * (1.0 / jnp.sqrt(d_in))
        b1 = jnp.zeros((1, d_out), jnp.float32)
        w2 = jax.random.normal(k2, (d_out, d_out), jnp.float32) * (1.0 / jnp.sqrt(d_out))
        b2 = jnp.zeros((1, d_out), jnp.float32)
        params.append((w1, b1, w2, b2))
    return params


def _pack_gin_params(params, pad):
    """Zero-pad every layer's (w1,b1,w2,b2) to [pad,pad]/[1,pad] and stack along a layer axis."""
    num_layers = len(params)
    w1s = jnp.zeros((num_layers, pad, pad), jnp.float32)
    b1s = jnp.zeros((num_layers, 1, pad), jnp.float32)
    w2s = jnp.zeros((num_layers, pad, pad), jnp.float32)
    b2s = jnp.zeros((num_layers, 1, pad), jnp.float32)
    for l, (w1, b1, w2, b2) in enumerate(params):
        w1s = w1s.at[l, : w1.shape[0], : w1.shape[1]].set(w1)
        b1s = b1s.at[l, :, : b1.shape[1]].set(b1)
        w2s = w2s.at[l, : w2.shape[0], : w2.shape[1]].set(w2)
        b2s = b2s.at[l, :, : b2.shape[1]].set(b2)
    return w1s, b1s, w2s, b2s


def hon_similarity(x, edge_index, params):
    """Fused GIN encoder + cosine similarity. Returns the [n, n] similarity matrix."""
    n, f = x.shape
    hid = params[-1][2].shape[1]
    assert max(f, hid) <= FEAT_PAD, "feature/hidden dim exceeds FEAT_PAD padding"
    n_pad = _round_up(max(n, TILE), TILE)

    # Dense adjacency (binary/count) from edge_index; bf16 is lossless for small integer counts.
    adj = (jnp.zeros((n_pad, n_pad), jnp.float32)
           .at[edge_index[0], edge_index[1]].add(1.0)
           .astype(jnp.bfloat16))
    x_pad = jnp.zeros((n_pad, FEAT_PAD), jnp.float32).at[:n, :f].set(x.astype(jnp.float32))
    w1s, b1s, w2s, b2s = _pack_gin_params(params, FEAT_PAD)

    sim_pad = _hon_fused_call(adj, x_pad, w1s, b1s, w2s, b2s, num_layers=len(params))
    return sim_pad[:n, :n]   # crop padding so it never enters keep_edges / top-k


def hon_augmentor(x, edge_index, params, *, edge_mul=2, keep_edges=True):
    n = x.shape[0]
    e = edge_index.shape[1]

    sim = hon_similarity(x, edge_index, params)

    if keep_edges:
        sim = sim.at[edge_index[0], edge_index[1]].add(jnp.max(sim))

    # TODO(synk): for very large graphs, add a per-row-tile partial top-k inside the fused
    # kernel so the full N^2 similarity matrix does not round-trip through HBM for lax.top_k.
    k = edge_mul * e
    vals, flat_idx = jax.lax.top_k(sim.reshape(-1), k)
    rows = (flat_idx // n).astype(jnp.int32)
    cols = (flat_idx % n).astype(jnp.int32)
    edge_index_new = jnp.stack([rows, cols], axis=0)

    # softmax(edge_weight, edge_index_[0]): segment softmax over source nodes (glue).
    seg_max = jax.ops.segment_max(vals, rows, num_segments=n)
    ex = jnp.exp(vals - seg_max[rows])
    seg_sum = jax.ops.segment_sum(ex, rows, num_segments=n)
    edge_weight = ex / (seg_sum[rows] + 1e-16)

    return {"x": x, "edge_index": edge_index_new, "edge_attr": edge_weight, "batch": None}


def topology_augmentor_wrapper(x, edge_index, edge_attr, params, *, edge_mul=2, keep_edges=True):
    # view1: IdentityAugmentor -> kwargs unchanged.
    view1 = {"x": x, "edge_index": edge_index, "edge_attr": edge_attr}
    # view2: HONAugmentor.
    view2 = hon_augmentor(x, edge_index, params, edge_mul=edge_mul, keep_edges=keep_edges)
    return view1, view2


# --------------------------------- Driver ----------------------------------

if __name__ == "__main__":
    key = jax.random.PRNGKey(0)
    kx, ke, kp = jax.random.split(key, 3)

    # Small graph: 16 nodes, 8-dim node features, 24 edges, 4-dim edge features.
    N, IN_DIM, EDGE_DIM, E = 16, 8, 4, 24
    AUG_DIM, NUM_LAYERS, EDGE_MUL, KEEP_EDGES = 32, 2, 2, True

    x = jax.random.normal(kx, (N, IN_DIM), jnp.float32)
    # Unique edges (deterministic): sample E distinct (src, dst) pairs.
    perm = jax.random.permutation(ke, N * N)[:E]
    edge_index = jnp.stack([(perm // N).astype(jnp.int32), (perm % N).astype(jnp.int32)], axis=0)
    edge_attr = jax.random.normal(kp, (E, EDGE_DIM), jnp.float32)

    params = init_gin_params(kp, IN_DIM, AUG_DIM, NUM_LAYERS)

    view1, view2 = topology_augmentor_wrapper(
        x, edge_index, edge_attr, params, edge_mul=EDGE_MUL, keep_edges=KEEP_EDGES
    )
    jax.block_until_ready((view1["x"], view2["edge_index"], view2["edge_attr"]))

    # Sanity check of the fused Pallas path against a pure-JAX float32 reference.
    sim_kernel = hon_similarity(x, edge_index, params)
    adj_ref = jnp.zeros((N, N), jnp.float32).at[edge_index[0], edge_index[1]].add(1.0)
    h_ref = x
    for (w1, b1, w2, b2) in params:
        agg = h_ref + adj_ref @ h_ref
        h_ref = jnp.maximum(jnp.maximum(agg @ w1 + b1, 0.0) @ w2 + b2, 0.0)
    hn = h_ref * jax.lax.rsqrt(jnp.sum(h_ref * h_ref, axis=-1, keepdims=True) + 1e-12)
    sim_ref = hn @ hn.T
    max_err = float(jnp.max(jnp.abs(sim_kernel - sim_ref)))
    assert max_err < 5e-2, f"fused kernel mismatch: max_err={max_err}"

    assert view1["x"].shape == (N, IN_DIM)
    assert view2["edge_index"].shape == (2, EDGE_MUL * E)
    assert view2["edge_attr"].shape == (EDGE_MUL * E,)
    print("KERNEL_OK")
</pallas_src>

<mosaic_0001>
module attributes {stable_mosaic.version = 11 : i64} {
  func.func @_hon_fused_kernel(%arg0: i32, %arg1: i32, %arg2: memref<128x128xbf16, #tpu.memory_space<vmem>>, %arg3: memref<128x128xf32, #tpu.memory_space<vmem>>, %arg4: memref<1x128x128xf32, #tpu.memory_space<vmem>>, %arg5: memref<1x1x128xf32, #tpu.memory_space<vmem>>, %arg6: memref<1x128x128xf32, #tpu.memory_space<vmem>>, %arg7: memref<1x1x128xf32, #tpu.memory_space<vmem>>, %arg8: memref<128x128xf32, #tpu.memory_space<vmem>>, %arg9: memref<128x128xf32, #tpu.memory_space<vmem>>, %arg10: memref<128x128xf32, #tpu.memory_space<vmem>>) attributes {dimension_semantics = [#tpu.dimension_semantics<arbitrary>, #tpu.dimension_semantics<arbitrary>], iteration_bounds = array<i64: 3, 1>, scalar_prefetch = 0 : i64, scratch_operands = 2 : i64, tpu.core_type = #tpu.core_type<tc>, window_params = [{transform_indices = @transform_0, window_bounds = array<i64: 128, 128>}, {pipeline_mode = #tpu.pipeline_mode<synchronous>, transform_indices = @transform_1, window_bounds = array<i64: 128, 128>}, {transform_indices = @transform_2, window_bounds = array<i64: 1, 128, 128>}, {transform_indices = @transform_3, window_bounds = array<i64: 1, 1, 128>}, {transform_indices = @transform_4, window_bounds = array<i64: 1, 128, 128>}, {transform_indices = @transform_5, window_bounds = array<i64: 1, 1, 128>}, {transform_indices = @transform_6, window_bounds = array<i64: 128, 128>}]} {
    %c128_i32 = arith.constant 128 : i32
    %0 = arith.muli %arg1, %c128_i32 : i32
    %1 = tpu.assume_multiple %0, 128 : i32
    %c0_i32 = arith.constant 0 : i32
    %2 = arith.cmpi eq, %arg1, %c0_i32 : i32
    %c0_i32_0 = arith.constant 0 : i32
    %3 = arith.cmpi eq, %arg0, %c0_i32_0 : i32
    %4 = arith.andi %2, %3 : i1
    %5 = arith.extui %4 : i1 to i32
    %c0_i32_1 = arith.constant 0 : i32
    %6 = arith.cmpi ne, %5, %c0_i32_1 : i32
    scf.if %6 {
      %c0 = arith.constant 0 : index
      %c0_12 = arith.constant 0 : index
      %25 = vector.load %arg3[%c0, %c0_12] : memref<128x128xf32, #tpu.memory_space<vmem>>, vector<128x128xf32>
      %c0_13 = arith.constant 0 : index
      %c0_14 = arith.constant 0 : index
      %26 = vector.load %arg9[%c0_13, %c0_14] : memref<128x128xf32, #tpu.memory_space<vmem>>, vector<128x128xf32>
      tpu.vector_store %arg9[%c0_13, %c0_14], %25 {strides = array<i32>} : memref<128x128xf32, #tpu.memory_space<vmem>>, vector<128x128xf32>,
    } else {
    }
    %c0_i32_2 = arith.constant 0 : i32
    %7 = arith.cmpi eq, %arg1, %c0_i32_2 : i32
    %c0_i32_3 = arith.constant 0 : i32
    %8 = arith.cmpi sgt, %arg0, %c0_i32_3 : i32
    %9 = arith.andi %7, %8 : i1
    %c2_i32 = arith.constant 2 : i32
    %10 = arith.cmpi slt, %arg0, %c2_i32 : i32
    %11 = arith.andi %9, %10 : i1
    %12 = arith.extui %11 : i1 to i32
    %c0_i32_4 = arith.constant 0 : i32
    %13 = arith.cmpi ne, %12, %c0_i32_4 : i32
    scf.if %13 {
      %c0 = arith.constant 0 : index
      %c0_12 = arith.constant 0 : index
      %25 = vector.load %arg10[%c0, %c0_12] : memref<128x128xf32, #tpu.memory_space<vmem>>, vector<128x128xf32>
      %c0_13 = arith.constant 0 : index
      %c0_14 = arith.constant 0 : index
      %26 = vector.load %arg9[%c0_13, %c0_14] : memref<128x128xf32, #tpu.memory_space<vmem>>, vector<128x128xf32>
      tpu.vector_store %arg9[%c0_13, %c0_14], %25 {strides = array<i32>} : memref<128x128xf32, #tpu.memory_space<vmem>>, vector<128x128xf32>,
    } else {
    }
    %c0_i32_5 = arith.constant 0 : i32
    %14 = arith.cmpi eq, %arg1, %c0_i32_5 : i32
    %c2_i32_6 = arith.constant 2 : i32
    %15 = arith.cmpi eq, %arg0, %c2_i32_6 : i32
    %16 = arith.andi %14, %15 : i1
    %17 = arith.extui %16 : i1 to i32
    %c0_i32_7 = arith.constant 0 : i32
    %18 = arith.cmpi ne, %17, %c0_i32_7 : i32
    scf.if %18 {
      %c0 = arith.constant 0 : index
      %c0_12 = arith.constant 0 : index
      %25 = vector.load %arg10[%c0, %c0_12] : memref<128x128xf32, #tpu.memory_space<vmem>>, vector<128x128xf32>
      %26 = arith.mulf %25, %25 : vector<128x128xf32>
      %cst = arith.constant dense<0.000000e+00> : vector<128xf32>
      %27 = vector.multi_reduction <add>, %26, %cst [1] : vector<128x128xf32> to vector<128xf32>
      %28 = vector.shape_cast %27 : vector<128xf32> to vector<128x1xf32>
      %cst_13 = arith.constant 9.99999996E-13 : f32
      %29 = vector.broadcast %cst_13 : f32 to vector<128x1xf32>
      %30 = arith.addf %28, %29 : vector<128x1xf32>
      %31 = math.rsqrt %30 : vector<128x1xf32>
      %32 = vector.broadcast %31 : vector<128x1xf32> to vector<128x128xf32>
      %33 = arith.mulf %25, %32 : vector<128x128xf32>
      %c0_14 = arith.constant 0 : index
      %c0_15 = arith.constant 0 : index
      %34 = vector.load %arg9[%c0_14, %c0_15] : memref<128x128xf32, #tpu.memory_space<vmem>>, vector<128x128xf32>
      tpu.vector_store %arg9[%c0_14, %c0_15], %33 {strides = array<i32>} : memref<128x128xf32, #tpu.memory_space<vmem>>, vector<128x128xf32>,
    } else {
    }
    %c2_i32_8 = arith.constant 2 : i32
    %19 = arith.cmpi slt, %arg0, %c2_i32_8 : i32
    %20 = arith.extui %19 : i1 to i32
    %c0_i32_9 = arith.constant 0 : i32
    %21 = arith.cmpi ne, %20, %c0_i32_9 : i32
    scf.if %21 {
      %c0 = arith.constant 0 : index
      %c0_12 = arith.constant 0 : index
      %25 = vector.load %arg9[%c0, %c0_12] : memref<128x128xf32, #tpu.memory_space<vmem>>, vector<128x128xf32>
      %26 = arith.index_cast %1 : i32 to index
      %c0_13 = arith.constant 0 : index
      %27 = vector.load %arg9[%26, %c0_13] : memref<128x128xf32, #tpu.memory_space<vmem>>, vector<128x128xf32>
      %c0_14 = arith.constant 0 : index
      %c0_15 = arith.constant 0 : index
      %28 = vector.load %arg2[%c0_14, %c0_15] : memref<128x128xbf16, #tpu.memory_space<vmem>>, vector<128x128xbf16>
      %29 = arith.truncf %25 : vector<128x128xf32> to vector<128x128xbf16>
      %cst = arith.constant dense<0.000000e+00> : vector<128x128xf32>
      %30 = tpu.matmul %28, %29, %cst {dimension_numbers = #tpu.dot_dimension_numbers<[1], [0], [0], [1], [0, 0, 1, 1], [], []>} : vector<128x128xbf16>, vector<128x128xbf16>, vector<128x128xf32> -> vector<128x128xf32>
      %31 = arith.addf %27, %30 : vector<128x128xf32>
      %c0_16 = arith.constant 0 : index
      %c0_17 = arith.constant 0 : index
      %c0_18 = arith.constant 0 : index
      %32 = vector.load %arg4[%c0_16, %c0_17, %c0_18] : memref<1x128x128xf32, #tpu.memory_space<vmem>>, vector<1x128x128xf32>
      %33 = vector.shape_cast %32 : vector<1x128x128xf32> to vector<128x128xf32>
      %cst_19 = arith.constant dense<0.000000e+00> : vector<128x128xf32>
      %34 = tpu.matmul %31, %33, %cst_19 {dimension_numbers = #tpu.dot_dimension_numbers<[1], [0], [0], [1], [0, 0, 1, 1], [], []>} : vector<128x128xf32>, vector<128x128xf32>, vector<128x128xf32> -> vector<128x128xf32>
      %c0_20 = arith.constant 0 : index
      %c0_21 = arith.constant 0 : index
      %c0_22 = arith.constant 0 : index
      %35 = vector.load %arg5[%c0_20, %c0_21, %c0_22] : memref<1x1x128xf32, #tpu.memory_space<vmem>>, vector<1x1x128xf32>
      %36 = vector.shape_cast %35 : vector<1x1x128xf32> to vector<1x128xf32>
      %37 = vector.broadcast %36 : vector<1x128xf32> to vector<128x128xf32>
      %38 = arith.addf %34, %37 : vector<128x128xf32>
      %cst_23 = arith.constant 0.000000e+00 : f32
      %39 = vector.broadcast %cst_23 : f32 to vector<128x128xf32>
      %40 = arith.maximumf %38, %39 : vector<128x128xf32>
      %c0_24 = arith.constant 0 : index
      %c0_25 = arith.constant 0 : index
      %c0_26 = arith.constant 0 : index
      %41 = vector.load %arg6[%c0_24, %c0_25, %c0_26] : memref<1x128x128xf32, #tpu.memory_space<vmem>>, vector<1x128x128xf32>
      %42 = vector.shape_cast %41 : vector<1x128x128xf32> to vector<128x128xf32>
      %cst_27 = arith.constant dense<0.000000e+00> : vector<128x128xf32>
      %43 = tpu.matmul %40, %42, %cst_27 {dimension_numbers = #tpu.dot_dimension_numbers<[1], [0], [0], [1], [0, 0, 1, 1], [], []>} : vector<128x128xf32>, vector<128x128xf32>, vector<128x128xf32> -> vector<128x128xf32>
      %c0_28 = arith.constant 0 : index
      %c0_29 = arith.constant 0 : index
      %c0_30 = arith.constant 0 : index
      %44 = vector.load %arg7[%c0_28, %c0_29, %c0_30] : memref<1x1x128xf32, #tpu.memory_space<vmem>>, vector<1x1x128xf32>
      %45 = vector.shape_cast %44 : vector<1x1x128xf32> to vector<1x128xf32>
      %46 = vector.broadcast %45 : vector<1x128xf32> to vector<128x128xf32>
      %47 = arith.addf %43, %46 : vector<128x128xf32>
      %cst_31 = arith.constant 0.000000e+00 : f32
      %48 = vector.broadcast %cst_31 : f32 to vector<128x128xf32>
      %49 = arith.maximumf %47, %48 : vector<128x128xf32>
      %50 = arith.index_cast %1 : i32 to index
      %c0_32 = arith.constant 0 : index
      %51 = vector.load %arg10[%50, %c0_32] : memref<128x128xf32, #tpu.memory_space<vmem>>, vector<128x128xf32>
      tpu.vector_store %arg10[%50, %c0_32], %49 {strides = array<i32>} : memref<128x128xf32, #tpu.memory_space<vmem>>, vector<128x128xf32>,
    } else {
    }
    %c2_i32_10 = arith.constant 2 : i32
    %22 = arith.cmpi eq, %arg0, %c2_i32_10 : i32
    %23 = arith.extui %22 : i1 to i32
    %c0_i32_11 = arith.constant 0 : i32
    %24 = arith.cmpi ne, %23, %c0_i32_11 : i32
    scf.if %24 {
      %25 = arith.index_cast %1 : i32 to index
      %c0 = arith.constant 0 : index
      %26 = vector.load %arg9[%25, %c0] : memref<128x128xf32, #tpu.memory_space<vmem>>, vector<128x128xf32>
      %c0_12 = arith.constant 0 : index
      %c0_13 = arith.constant 0 : index
      %27 = vector.load %arg9[%c0_12, %c0_13] : memref<128x128xf32, #tpu.memory_space<vmem>>, vector<128x128xf32>
      %cst = arith.constant dense<0.000000e+00> : vector<128x128xf32>
      %28 = tpu.matmul %26, %27, %cst {dimension_numbers = #tpu.dot_dimension_numbers<[1], [1], [0], [0], [0, 0, 1, 0], [], []>} : vector<128x128xf32>, vector<128x128xf32>, vector<128x128xf32> -> vector<128x128xf32>
      %c0_14 = arith.constant 0 : index
      %c0_15 = arith.constant 0 : index
      %29 = vector.load %arg8[%c0_14, %c0_15] : memref<128x128xf32, #tpu.memory_space<vmem>>, vector<128x128xf32>
      tpu.vector_store %arg8[%c0_14, %c0_15], %28 {strides = array<i32>} : memref<128x128xf32, #tpu.memory_space<vmem>>, vector<128x128xf32>,
    } else {
    }
    return
  }
  func.func @transform_0(%arg0: i32, %arg1: i32) -> (i32, i32) {
    %c2_i32 = arith.constant 2 : i32
    %0 = arith.cmpi slt, %arg0, %c2_i32 : i32
    %c0_i32 = arith.constant 0 : i32
    %1 = arith.select %0, %arg1, %c0_i32 : i32
    %c0_i32_0 = arith.constant 0 : i32
    %c0_i32_1 = arith.constant 0 : i32
    return %1, %c0_i32_0 : i32, i32
  }
  func.func @transform_1(%arg0: i32, %arg1: i32) -> (i32, i32) {
    %c0_i32 = arith.constant 0 : i32
    %c0_i32_0 = arith.constant 0 : i32
    %c0_i32_1 = arith.constant 0 : i32
    return %c0_i32, %c0_i32_0 : i32, i32
  }
  func.func @transform_2(%arg0: i32, %arg1: i32) -> (i32, i32, i32) {
    %c1_i32 = arith.constant 1 : i32
    %0 = arith.minsi %arg0, %c1_i32 : i32
    %c0_i32 = arith.constant 0 : i32
    %c0_i32_0 = arith.constant 0 : i32
    %c0_i32_1 = arith.constant 0 : i32
    return %0, %c0_i32, %c0_i32_0 : i32, i32, i32
  }
  func.func @transform_3(%arg0: i32, %arg1: i32) -> (i32, i32, i32) {
    %c1_i32 = arith.constant 1 : i32
    %0 = arith.minsi %arg0, %c1_i32 : i32
    %c0_i32 = arith.constant 0 : i32
    %c0_i32_0 = arith.constant 0 : i32
    %c0_i32_1 = arith.constant 0 : i32
    return %0, %c0_i32, %c0_i32_0 : i32, i32, i32
  }
  func.func @transform_4(%arg0: i32, %arg1: i32) -> (i32, i32, i32) {
    %c1_i32 = arith.constant 1 : i32
    %0 = arith.minsi %arg0, %c1_i32 : i32
    %c0_i32 = arith.constant 0 : i32
    %c0_i32_0 = arith.constant 0 : i32
    %c0_i32_1 = arith.constant 0 : i32
    return %0, %c0_i32, %c0_i32_0 : i32, i32, i32
  }
  func.func @transform_5(%arg0: i32, %arg1: i32) -> (i32, i32, i32) {
    %c1_i32 = arith.constant 1 : i32
    %0 = arith.minsi %arg0, %c1_i32 : i32
    %c0_i32 = arith.constant 0 : i32
    %c0_i32_0 = arith.constant 0 : i32
    %c0_i32_1 = arith.constant 0 : i32
    return %0, %c0_i32, %c0_i32_0 : i32, i32, i32
  }
  func.func @transform_6(%arg0: i32, %arg1: i32) -> (i32, i32) {
    %c2_i32 = arith.constant 2 : i32
    %0 = arith.cmpi eq, %arg0, %c2_i32 : i32
    %c0_i32 = arith.constant 0 : i32
    %1 = arith.select %0, %arg1, %c0_i32 : i32
    %c0_i32_0 = arith.constant 0 : i32
    %c0_i32_1 = arith.constant 0 : i32
    return %1, %c0_i32_0 : i32, i32
  }
}

</mosaic_0001>

<bundles_post_ra>
// kernel: tpu_custom_call.1
= control target key start
LH: loop header
LB: loop body
LE: loop exit
PB: predicated region body
PF: predicated region fallthrough
CT: control target
= control target key end

     0   :  { %s3015_s0 = inlined_call_operand.hbm [shape: bf16[128,128], index: 0, kind: input, shape index: {}]   ;;  %s3016_s1 = inlined_call_operand.hbm [shape: f32[128,128], index: 1, kind: input, shape index: {}]   ;;  %s3017_s2 = inlined_call_operand.hbm [shape: f32[2,128,128], index: 2, kind: input, shape index: {}]   ;;  %s3018_s3 = inlined_call_operand.vmem [shape: f32[2,1,128], index: 3, kind: input, shape index: {}]   ;;  %s3019_s4 = inlined_call_operand.hbm [shape: f32[2,128,128], index: 4, kind: input, shape index: {}]   ;;  %s3020_s5 = inlined_call_operand.vmem [shape: f32[2,1,128], index: 5, kind: input, shape index: {}]   ;;  %s3021_s6 = inlined_call_operand.hbm [shape: f32[128,128], index: 6, kind: output, shape index: {}]  }
   0x1   :  { %3028 = sst [smem:[#allocation16_spill]] %s3015_s0 }
   0x2   :  { %11 = vsyncpa [#allocation5], 0 }
   0x3   :  { %13 = vsyncpa [#allocation5 + $0x1], 0 }
   0x4   :  { %14 = vsyncpa [#allocation8], 0 }
   0x5   :  { %15 = vsyncpa [#allocation6], 0 }
   0x6   :  { %17 = vsyncpa [#allocation6 + $0x1], 0  ;;  %s2524_s21 = smov 0   ;;  %s2526_s22 = smov 0  }
   0x7   :  { %s2528_s23 = smov 0   ;;  %s2530_s24 = smov 0  }
   0x8   :  { %s2532_s25 = smov 0   ;;  %s2534_s26 = smov 0  }
   0x9 LB: > { %p104_p0 = scmp.ne.s32.totalorder %s2464_s23, %s2460_s22  ;;  %p105_p1 = scmp.eq.s32.totalorder %s2476_s26, 0  ;;  %s2476_s26 = sphi %s2534_s26, %s23_s26   ;;  %s2472_s25 = sphi %s2532_s25, %s3051_s25   ;;  %s2468_s24 = sphi %s2530_s24, %s3050_s24   ;;  %s2464_s23 = sphi %s2528_s23, %s3049_s23   ;;  %s2460_s22 = sphi %s2526_s22, %s3048_s22   ;;  %s2456_s21 = sphi %s2524_s21, %s3047_s21  }
   0xa   : > { %p3022_p2 = scmp.lt.s32.totalorder %s2476_s26, 3  ;;  %s267_s29 = sand.u32 1, %s2476_s26  }
   0xb   : > { %p2559_p3 = por %p105_p1, %p104_p0  ;;  %s2478_s30 = smov [#allocation4]  }
   0xc   : > { %s280_s7 = sshll.u32 %s2478_s30, 4  ;;  %p2566_p4 = pnand %p3022_p2, %p105_p1  ;;  %s281_s7 = int_to_ptr.vmem [resolvable:$true] %s280_s7 }
   0xd   : > { %s3029_s28 = scalar_select %p2559_p3, 1, 0 }
   0xe   : > { %s2570_s9 = scalar_lea.sflag [#allocation5], %s267_s29  ;;  %s3031_s0 = sld [smem:[#allocation16_spill]] }
   0xf   : > { %p2274_p6 = pneg %p2566_p4 }
  0x14   : > { %s2272_s12 = scalar_lea.hbm %s3031_s0, 1024 }
  0x15   : > { %p2273_p5 = scmp.ne.s32.totalorder %s3031_s0, %s2272_s12  ;;  %p2279_p9 = scmp.lt.u32.totalorder %s2272_s12, %s3031_s0 }
  0x17   : > { %p2275_p7 = pnand %p2274_p6, %p2273_p5 }
  0x19   : > { %p2276_p8 = pneg %p2275_p7 }
  0x1b   : > { %p2281_p10 = pnand %p2279_p9, %p2276_p8 }
  0x1d   : > { %2284 = shalt.err (!%p2281_p10)
}
  0x1e   : > { %s2285_s17 = scalar_lea.vmem %s281_s7, 1024  ;;  %s2292_s18 = scalar_lea.vmem %s281_s7, 2048 }
  0x1f   : > { %p2286_p11 = scmp.ne.s32.totalorder %s281_s7, %s2285_s17  ;;  %p2293_p0 = scmp.lt.s32.totalorder %s281_s7, %s281_s7 }
  0x20   : > { %p2294_p1 = scmp.lt.s32.totalorder %s2292_s18, %s2285_s17 }
  0x21   : > { %p2288_p12 = pnand %p2286_p11, %p2274_p6 }
  0x22   : > { %p2295_p2 = por %p2294_p1, %p2293_p0 }
  0x23   : > { %p2289_p13 = pneg %p2288_p12 }
  0x25   : > { %p2296_p3 = pnand %p2295_p2, %p2289_p13 }
  0x27   : > { %2299 = shalt.err (!%p2296_p3)
}
  0x28   : > { %s2479_s19 = smov 64   ;;  %s2480_s20 = smov 4  }
  0x29   : > { %2156 = dma.hbm_to_vmem [thread:$0]  (!%p2566_p4), %s3031_s0, 1024, %s281_s7, %s2570_s9, %s2479_s19, %s2479_s19, %s2480_s20  }
  0x2a   : > { %p3032_p5 = scmp.ne.s32.totalorder %s3029_s28, 0  ;;  %p3033_p6 = scmp.lt.s32.totalorder %s2476_s26, 3 }
  0x2b   : > { %s97_s11 = sadd.s32 1, %s2464_s23  ;;  %s35_s12 = sadd.s32 1, %s2472_s25 }
  0x2c   : > { %p2593_p2 = pnand %p3033_p6, %p3032_p5  ;;  %p37_p3 = scmp.ge.s32.totalorder %s35_s12, 3 }
  0x2d   : > { %p90_p7 = scmp.lt.s32.totalorder %s2472_s25, 1  ;;  %s292_s28 = sand.u32 1, %s2464_s23  }
  0x2e   : > { %s3053_s12 = smov (%p37_p3, %s35_s12), 0  ;;  %s2607_s7 = sshll.u32 %s292_s28, 7 }
  0x2f   : > { %s2603_s8 = scalar_select %p90_p7, %s2472_s25, 1 }
  0x30   : > { %p92_p4 = scmp.lt.s32.totalorder %s3053_s12, 1  ;;  %s294_s19 = scalar_lea.vmem [#allocation9], %s2607_s7 }
  0x31   : > { %s1688_s13 = sshll.u32 %s2603_s8, 11  ;;  %s303_s20 = sshll.u32 %s294_s19, 4  ;;  %s2624_s20 = int_to_ptr.vmem [resolvable:$true] %s303_s20 }
  0x32   : > { %s93_s14 = scalar_select %p92_p4, %s3053_s12, 1 }
  0x33   : > { %s2616_s17 = scalar_lea.hbm %s3017_s2, %s1688_s13  ;;  %p2302_p10 = pneg %p2593_p2 }
  0x34   : > { %s94_s18 = ssub.s32 %s2603_s8, %s93_s14  ;;  %s2300_s30 = scalar_lea.hbm %s2616_s17, 2048 }
  0x35   : > { %p2620_p8 = scmp.eq.s32.totalorder %s94_s18, 0  ;;  %p2301_p9 = scmp.ne.s32.totalorder %s2616_s17, %s2300_s30 }
  0x36   : > { %s2305_s14 = scalar_lea.hbm %s3017_s2, 4096  ;;  %p2306_p13 = scmp.lt.u32.totalorder %s2616_s17, %s3017_s2 }
  0x37   : > { %p2303_p11 = pnand %p2302_p10, %p2301_p9  ;;  %p2307_p0 = scmp.lt.u32.totalorder %s2305_s14, %s2300_s30 }
  0x38   : > { %p2309_p5 = scmp.lt.u32.totalorder %s2300_s30, %s2616_s17 }
  0x39   : > { %p2304_p12 = pneg %p2303_p11  ;;  %p2308_p1 = por %p2307_p0, %p2306_p13 }
  0x3b   : > { %p2310_p6 = por %p2309_p5, %p2308_p1 }
  0x3d   : > { %p2311_p3 = pnand %p2310_p6, %p2304_p12 }
  0x3f   : > { %2314 = shalt.err (!%p2311_p3)
}
  0x40   : > { %s2315_s18 = scalar_lea.vmem %s2624_s20, 2048  ;;  %s2481_s28 = smov [#allocation9]  }
  0x41   : > { %p2316_p7 = scmp.ne.s32.totalorder %s2624_s20, %s2315_s18  ;;  %s2320_s15 = sshll.u32 %s2481_s28, 4  ;;  %s2321_s15 = int_to_ptr.vmem [resolvable:$false] %s2320_s15 }
  0x42   : > { %s2322_s16 = scalar_lea.vmem %s2321_s15, 4096  ;;  %p2323_p11 = scmp.lt.s32.totalorder %s2624_s20, %s2321_s15 }
  0x43   : > { %p2318_p4 = pnand %p2316_p7, %p2302_p10  ;;  %p2324_p13 = scmp.lt.s32.totalorder %s2322_s16, %s2315_s18 }
  0x45   : > { %p2319_p9 = pneg %p2318_p4  ;;  %p2325_p0 = por %p2324_p13, %p2323_p11 }
  0x47   : > { %p2326_p1 = pnand %p2325_p0, %p2319_p9 }
  0x49   : > { %2329 = shalt.err (!%p2326_p1)
}
  0x4a   : > { %s3023_s30 = smov 128   ;;  %s2483_s14 = smov 8  }
  0x4b   : > { %2159 = dma.hbm_to_vmem [thread:$0]  (!%p2593_p2), %s2616_s17, 2048, %s2624_s20, %s2570_s9, %s3023_s30, %s3023_s30, %s2483_s14  }
  0x4c   : > { %s2660_s19 = scalar_select %p2620_p8, %s2464_s23, %s97_s11  }
  0x4d   : > { %s2663_s18 = sadd.s32 4294967295, %s2476_s26   ;;  %p110_p12 = scmp.ne.s32.totalorder %s2460_s22, %s2456_s21 }
  0x4e   : > { %p3025_p5 = scmp.eq.s32.totalorder %s2663_s18, 0  ;;  %p1648_p6 = scmp.ge.s32.totalorder %s2476_s26, 1 }
  0x4f   : > { %p241_p3 = scmp.lt.s32.totalorder %s2476_s26, 4  ;;  %s2484_s11 = smov [#allocation7]  }
  0x50   : > { %p2672_p7 = por %p3025_p5, %p110_p12  ;;  %s253_s20 = sshll.u32 %s2484_s11, 4  ;;  %s2689_s20 = int_to_ptr.vmem [resolvable:$true] %s253_s20 }
  0x51   : > { %p2676_p4 = pnand %p1648_p6, %p241_p3  ;;  %s2687_s15 = scalar_lea.hbm %s3019_s4, %s1688_s13 }
  0x52   : > { %s3036_s28 = scalar_select %p2672_p7, 1, 0 }
  0x53   : > { %s3037_s17 = scalar_select %p2676_p4, 1, 0 }
  0x54   : > { %p2149_p8 = pneg %p2676_p4  ;;  %s327_s16 = scalar_lea.vmem [#allocation10], %s2607_s7 }
  0x55   : > { %s336_s27 = sshll.u32 %s327_s16, 4  ;;  %s2330_s8 = scalar_lea.hbm %s2687_s15, 2048  ;;  %s2698_s27 = int_to_ptr.vmem [resolvable:$true] %s336_s27 }
  0x56   : > { %p2694_p9 = pnand %p2149_p8, %p3025_p5  ;;  %p2331_p11 = scmp.ne.s32.totalorder %s2687_s15, %s2330_s8 }
  0x57   : > { %s2335_s21 = scalar_lea.hbm %s3019_s4, 4096  ;;  %p2336_p1 = scmp.lt.u32.totalorder %s2687_s15, %s3019_s4 }
  0x58   : > { %p2333_p13 = pnand %p2331_p11, %p2302_p10  ;;  %p2337_p12 = scmp.lt.u32.totalorder %s2335_s21, %s2330_s8 }
  0x59   : > { %p2339_p3 = scmp.lt.u32.totalorder %s2330_s8, %s2687_s15 }
  0x5a   : > { %p2334_p0 = pneg %p2333_p13  ;;  %p2338_p6 = por %p2337_p12, %p2336_p1 }
  0x5c   : > { %p2340_p8 = por %p2339_p3, %p2338_p6 }
  0x5e   : > { %p2341_p5 = pnand %p2340_p8, %p2334_p0 }
  0x60   : > { %2344 = shalt.err (!%p2341_p5)
}
  0x61   : > { %s2345_s16 = scalar_lea.vmem %s2698_s27, 2048  ;;  %s2485_s13 = smov [#allocation10]  }
  0x62   : > { %p2346_p11 = scmp.ne.s32.totalorder %s2698_s27, %s2345_s16  ;;  %s2350_s11 = sshll.u32 %s2485_s13, 4  ;;  %s2351_s11 = int_to_ptr.vmem [resolvable:$false] %s2350_s11 }
  0x63   : > { %s2352_s29 = scalar_lea.vmem %s2351_s11, 4096  ;;  %p2353_p4 = scmp.lt.s32.totalorder %s2698_s27, %s2351_s11 }
  0x64   : > { %p2348_p13 = pnand %p2346_p11, %p2302_p10  ;;  %p2354_p1 = scmp.lt.s32.totalorder %s2352_s29, %s2345_s16 }
  0x66   : > { %p2349_p7 = pneg %p2348_p13  ;;  %p2355_p12 = por %p2354_p1, %p2353_p4 }
  0x68   : > { %p2356_p6 = pnand %p2355_p12, %p2349_p7 }
  0x6a   : > { %2359 = shalt.err (!%p2356_p6)
}
  0x6b   : > { %s3039_s8 = smov 128   ;;  %s2360_s13 = scalar_lea.hbm %s3016_s1, 2048 }
  0x6c   : > { %2162 = dma.hbm_to_vmem [thread:$0]  (!%p2593_p2), %s2687_s15, 2048, %s2698_s27, %s2570_s9, %s3039_s8, %s3039_s8, %s2483_s14  }
  0x6d   : > { %p2361_p10 = scmp.ne.s32.totalorder %s3016_s1, %s2360_s13  ;;  %p2362_p5 = pneg %p2694_p9 }
  0x6e   : > { %p2367_p0 = scmp.lt.u32.totalorder %s2360_s13, %s3016_s1 }
  0x6f   : > { %p2363_p7 = pnand %p2362_p5, %p2361_p10 }
  0x71   : > { %p2364_p4 = pneg %p2363_p7 }
  0x73   : > { %p2369_p3 = pnand %p2367_p0, %p2364_p4 }
  0x75   : > { %2372 = shalt.err (!%p2369_p3)
}
  0x76   : > { %s2373_s27 = scalar_lea.vmem %s2689_s20, 2048  ;;  %p2381_p13 = scmp.lt.s32.totalorder %s2689_s20, %s2689_s20 }
  0x77   : > { %p2374_p2 = scmp.ne.s32.totalorder %s2689_s20, %s2373_s27  ;;  %p2382_p1 = scmp.lt.s32.totalorder %s2373_s27, %s2373_s27 }
  0x79   : > { %p2376_p8 = pnand %p2374_p2, %p2362_p5  ;;  %p2383_p12 = por %p2382_p1, %p2381_p13 }
  0x7b   : > { %p2377_p11 = pneg %p2376_p8 }
  0x7d   : > { %p2384_p6 = pnand %p2383_p12, %p2377_p11 }
  0x7f   : > { %2387 = shalt.err (!%p2384_p6)
}
  0x80   : > { %2152 = dma.hbm_to_vmem [thread:$0]  (!%p2694_p9), %s3016_s1, 2048, %s2689_s20, [#allocation8], %s3039_s8, %s3039_s8, %s2483_s14  }
  0x81   : > { %p3040_p10 = scmp.ne.s32.totalorder %s3037_s17, 0 }
  0x82   : > { %s360_s15 = sand.u32 (!%p3040_p10), 1, %s2663_s18   ;;  %p3041_p5 = scmp.eq.s32.totalorder (!%p3040_p10), %s2663_s18, 0 }
  0x83   : > { %358 = sbr.rel (%p3040_p10) target bundleno = 1395 (0x573), region = 44  ;;  %s361_s29 = scalar_lea.sflag (!%p3040_p10), [#allocation5], %s360_s15 }
  0x8a   : > { %2439 = dma.done.wait (%p3041_p5), %s361_s29, 1024   ;;  %p3042_p7 = pmov %p3041_p5 }
  0x8b   : > { %p3043_p4 = pmov %p3041_p5 }
  0x8c   : > { %2441 = vsyncadd (%p3042_p7), %s361_s29, 4294966272 }
  0x8d   : > { %2443 = dma.done.wait (%p3043_p4), [#allocation8], 2048   ;;  %p3044_p0 = pmov %p3043_p4 }
  0x8e   : > { %s375_s30 = sand.u32 1, %s2460_s22   ;;  %p3045_p9 = scmp.ne.s32.totalorder %s3036_s28, 0 }
  0x8f   : > { %2445 = vsyncadd (%p3044_p0), [#allocation8], 4294965248  ;;  %s1661_s14 = sshll.u32 %s375_s30, 7 }
  0x90   : > { %s2763_s17 = scalar_lea.vmem [#allocation9], %s1661_s14 }
  0x91   : > { %2447 = dma.done.wait (%p3045_p9), %s361_s29, 4096  }
  0x92   : > { %2449 = vsyncadd (%p3045_p9), %s361_s29, 4294963200  ;;  %p440_p3 = scmp.lt.s32.totalorder %s2468_s24, 1  ;;  %p462_p2 = scmp.eq.s32.totalorder %s2468_s24, 0 }
  0x93   : > { %s2782_s28 = scalar_lea.vmem [#allocation10], %s1661_s14  ;;  %v467_v0 = vld [vmem:[#allocation7] sm:$0xff] (%p462_p2)  ;;  %v468_v1 = vld [vmem:[#allocation7 + $0x8] sm:$0xff] (%p462_p2)  ;;  %v469_v2 = vld [vmem:[#allocation7 + $0x10] sm:$0xff] (%p462_p2) }
  0x94   : > { %s441_s20 = scalar_select %p440_p3, %s2468_s24, 1 }
  0x95   : > { %466 = sbr.rel (!%p462_p2) target bundleno = 157 (0x9d), region = 64  ;;  %483 = vst [vmem:[#allocation2] sm:$0xff] (%p462_p2), %v467_v0  ;;  %484 = vst [vmem:[#allocation2 + $0x8] sm:$0xff] (%p462_p2), %v468_v1  ;;  %v470_v3 = vld [vmem:[#allocation7 + $0x18] sm:$0xff] (%p462_p2)  ;;  %v471_v4 = vld [vmem:[#allocation7 + $0x20] sm:$0xff] (%p462_p2) }
  0x96   : > { %s3055_s20 = smov (!%p440_p3, %s441_s20), 1  ;;  %485 = vst [vmem:[#allocation2 + $0x10] sm:$0xff] (%p462_p2), %v469_v2  ;;  %v472_v5 = vld [vmem:[#allocation7 + $0x28] sm:$0xff] (%p462_p2)  ;;  %486 = vst [vmem:[#allocation2 + $0x18] sm:$0xff] (%p462_p2), %v470_v3  ;;  %v473_v6 = vld [vmem:[#allocation7 + $0x30] sm:$0xff] (%p462_p2) }
  0x97   : > { %s444_s7 = scalar_lea.vmem %s3018_s3, %s3055_s20  ;;  %s453_s10 = scalar_lea.vmem %s3020_s5, %s3055_s20  ;;  %487 = vst [vmem:[#allocation2 + $0x20] sm:$0xff] (%p462_p2), %v471_v4  ;;  %488 = vst [vmem:[#allocation2 + $0x28] sm:$0xff] (%p462_p2), %v472_v5  ;;  %v474_v7 = vld [vmem:[#allocation7 + $0x38] sm:$0xff] (%p462_p2)  ;;  %v475_v8 = vld [vmem:[#allocation7 + $0x40] sm:$0xff] (%p462_p2) }
  0x98   : > { %489 = vst [vmem:[#allocation2 + $0x30] sm:$0xff] (%p462_p2), %v473_v6  ;;  %490 = vst [vmem:[#allocation2 + $0x38] sm:$0xff] (%p462_p2), %v474_v7  ;;  %v476_v9 = vld [vmem:[#allocation7 + $0x48] sm:$0xff] (%p462_p2)  ;;  %v477_v10 = vld [vmem:[#allocation7 + $0x50] sm:$0xff] (%p462_p2) }
  0x99   : > { %491 = vst [vmem:[#allocation2 + $0x40] sm:$0xff] (%p462_p2), %v475_v8  ;;  %v478_v11 = vld [vmem:[#allocation7 + $0x58] sm:$0xff] (%p462_p2)  ;;  %492 = vst [vmem:[#allocation2 + $0x48] sm:$0xff] (%p462_p2), %v476_v9  ;;  %v479_v12 = vld [vmem:[#allocation7 + $0x60] sm:$0xff] (%p462_p2) }
  0x9a   : > { %493 = vst [vmem:[#allocation2 + $0x50] sm:$0xff] (%p462_p2), %v477_v10  ;;  %494 = vst [vmem:[#allocation2 + $0x58] sm:$0xff] (%p462_p2), %v478_v11  ;;  %v480_v13 = vld [vmem:[#allocation7 + $0x68] sm:$0xff] (%p462_p2)  ;;  %v481_v14 = vld [vmem:[#allocation7 + $0x70] sm:$0xff] (%p462_p2) }
  0x9b   : > { %495 = vst [vmem:[#allocation2 + $0x60] sm:$0xff] (%p462_p2), %v479_v12  ;;  %496 = vst [vmem:[#allocation2 + $0x68] sm:$0xff] (%p462_p2), %v480_v13  ;;  %v482_v15 = vld [vmem:[#allocation7 + $0x78] sm:$0xff] (%p462_p2) }
  0x9c   : > { %497 = vst [vmem:[#allocation2 + $0x70] sm:$0xff] %v481_v14  ;;  %498 = vst [vmem:[#allocation2 + $0x78] sm:$0xff] %v482_v15 }
  0x9d PF: > { %p499_p8 = scmp.gt.s32.totalorder %s2468_s24, 0  ;;  %p502_p11 = scmp.lt.s32.totalorder %s2468_s24, 2 }
  0x9f   : > { %p503_p13 = pnand %p502_p11, %p499_p8 }
  0xa0   : > { %v507_v16 = vld [vmem:[#allocation3] sm:$0xff] (!%p503_p13)  ;;  %v508_v17 = vld [vmem:[#allocation3 + $0x8] sm:$0xff] (!%p503_p13)  ;;  %v509_v18 = vld [vmem:[#allocation3 + $0x10] sm:$0xff] (!%p503_p13) }
  0xa1   : > { %506 = sbr.rel (%p503_p13) target bundleno = 169 (0xa9), region = 68  ;;  %523 = vst [vmem:[#allocation2] sm:$0xff] (!%p503_p13), %v507_v16  ;;  %524 = vst [vmem:[#allocation2 + $0x8] sm:$0xff] (!%p503_p13), %v508_v17  ;;  %v510_v19 = vld [vmem:[#allocation3 + $0x18] sm:$0xff] (!%p503_p13)  ;;  %v511_v20 = vld [vmem:[#allocation3 + $0x20] sm:$0xff] (!%p503_p13) }
  0xa2   : > { %525 = vst [vmem:[#allocation2 + $0x10] sm:$0xff] (!%p503_p13), %v509_v18  ;;  %v512_v21 = vld [vmem:[#allocation3 + $0x28] sm:$0xff] (!%p503_p13)  ;;  %526 = vst [vmem:[#allocation2 + $0x18] sm:$0xff] (!%p503_p13), %v510_v19  ;;  %v513_v22 = vld [vmem:[#allocation3 + $0x30] sm:$0xff] (!%p503_p13) }
  0xa3   : > { %527 = vst [vmem:[#allocation2 + $0x20] sm:$0xff] (!%p503_p13), %v511_v20  ;;  %528 = vst [vmem:[#allocation2 + $0x28] sm:$0xff] (!%p503_p13), %v512_v21  ;;  %v514_v23 = vld [vmem:[#allocation3 + $0x38] sm:$0xff] (!%p503_p13)  ;;  %v515_v24 = vld [vmem:[#allocation3 + $0x40] sm:$0xff] (!%p503_p13) }
  0xa4   : > { %529 = vst [vmem:[#allocation2 + $0x30] sm:$0xff] (!%p503_p13), %v513_v22  ;;  %530 = vst [vmem:[#allocation2 + $0x38] sm:$0xff] (!%p503_p13), %v514_v23  ;;  %v516_v25 = vld [vmem:[#allocation3 + $0x48] sm:$0xff] (!%p503_p13)  ;;  %v517_v26 = vld [vmem:[#allocation3 + $0x50] sm:$0xff] (!%p503_p13) }
  0xa5   : > { %531 = vst [vmem:[#allocation2 + $0x40] sm:$0xff] (!%p503_p13), %v515_v24  ;;  %v518_v27 = vld [vmem:[#allocation3 + $0x58] sm:$0xff] (!%p503_p13)  ;;  %532 = vst [vmem:[#allocation2 + $0x48] sm:$0xff] (!%p503_p13), %v516_v25  ;;  %v519_v28 = vld [vmem:[#allocation3 + $0x60] sm:$0xff] (!%p503_p13) }
  0xa6   : > { %533 = vst [vmem:[#allocation2 + $0x50] sm:$0xff] (!%p503_p13), %v517_v26  ;;  %534 = vst [vmem:[#allocation2 + $0x58] sm:$0xff] (!%p503_p13), %v518_v27  ;;  %v520_v29 = vld [vmem:[#allocation3 + $0x68] sm:$0xff] (!%p503_p13)  ;;  %v521_v30 = vld [vmem:[#allocation3 + $0x70] sm:$0xff] (!%p503_p13) }
  0xa7   : > { %535 = vst [vmem:[#allocation2 + $0x60] sm:$0xff] (!%p503_p13), %v519_v28  ;;  %536 = vst [vmem:[#allocation2 + $0x68] sm:$0xff] (!%p503_p13), %v520_v29  ;;  %v522_v31 = vld [vmem:[#allocation3 + $0x78] sm:$0xff] (!%p503_p13) }
  0xa8   : > { %537 = vst [vmem:[#allocation2 + $0x70] sm:$0xff] %v521_v30  ;;  %538 = vst [vmem:[#allocation2 + $0x78] sm:$0xff] %v522_v31 }
  0xa9 PF: > { %p539_p1 = scmp.eq.s32.totalorder %s2468_s24, 2 }
  0xaa   : > { %v2787_v32 = vld [vmem:[#allocation3 + $0x10] sm:$0xff] (%p539_p1)  ;;  %v2789_v33 = vld [vmem:[#allocation3] sm:$0xff] (%p539_p1)  ;;  %v2791_v34 = vld [vmem:[#allocation3 + $0x18] sm:$0xff] (%p539_p1) }
  0xab   : > { %543 = sbr.rel (!%p539_p1) target bundleno = 360 (0x168), region = 72  ;;  %v562_v35 = vmul.f32 (%p539_p1), %v2787_v32, %v2787_v32  ;;  %v560_v36 = vmul.f32 (%p539_p1), %v2789_v33, %v2789_v33  ;;  %v2797_v37 = vld [vmem:[#allocation3 + $0x8] sm:$0xff] (%p539_p1)  ;;  %v563_v38 = vmul.f32 (%p539_p1), %v2791_v34, %v2791_v34  ;;  %v2805_v41 = vld [vmem:[#allocation3 + $0x20] sm:$0xff] (%p539_p1)  ;;  %v2811_v44 = vld [vmem:[#allocation3 + $0x38] sm:$0xff] (%p539_p1) }
  0xac   : > { %v561_v39 = vmul.f32 (%p539_p1), %v2797_v37, %v2797_v37  ;;  %v2803_v40 = vld [vmem:[#allocation3 + $0x28] sm:$0xff] (%p539_p1)  ;;  %v564_v43 = vmul.f32 (%p539_p1), %v2805_v41, %v2805_v41  ;;  %v2813_v45 = vld [vmem:[#allocation3 + $0x30] sm:$0xff] (%p539_p1)  ;;  %v567_v46 = vmul.f32 (%p539_p1), %v2811_v44, %v2811_v44  ;;  %v2821_v49 = vld [vmem:[#allocation3 + $0x40] sm:$0xff] (%p539_p1) }
  0xad   : > { %580 = vadd.xlane.f32.xlu1 (%p539_p1), %v562_v35  ;;  %576 = vadd.xlane.f32.xlu0 (%p539_p1), %v560_v36  ;;  %v565_v42 = vmul.f32 (%p539_p1), %v2803_v40, %v2803_v40  ;;  %v566_v47 = vmul.f32 (%p539_p1), %v2813_v45, %v2813_v45  ;;  %v2819_v48 = vld [vmem:[#allocation3 + $0x48] sm:$0xff] (%p539_p1)  ;;  %v568_v51 = vmul.f32 (%p539_p1), %v2821_v49, %v2821_v49  ;;  %v2827_v52 = vld [vmem:[#allocation3 + $0x58] sm:$0xff] (%p539_p1)  ;;  %v2829_v53 = vld [vmem:[#allocation3 + $0x50] sm:$0xff] (%p539_p1) }
  0xae   : > { %v569_v50 = vmul.f32 (%p539_p1), %v2819_v48, %v2819_v48  ;;  %v571_v54 = vmul.f32 (%p539_p1), %v2827_v52, %v2827_v52  ;;  %v570_v55 = vmul.f32 (%p539_p1), %v2829_v53, %v2829_v53  ;;  %v2835_v56 = vld [vmem:[#allocation3 + $0x68] sm:$0xff] (%p539_p1)  ;;  %v2837_v57 = vld [vmem:[#allocation3 + $0x60] sm:$0xff] (%p539_p1)  ;;  %v2843_v60 = vld [vmem:[#allocation3 + $0x78] sm:$0xff] (%p539_p1) }
  0xaf   : > { %v573_v58 = vmul.f32 (%p539_p1), %v2835_v56, %v2835_v56  ;;  %v572_v59 = vmul.f32 (%p539_p1), %v2837_v57, %v2837_v57  ;;  %v2845_v61 = vld [vmem:[#allocation3 + $0x70] sm:$0xff] (%p539_p1)  ;;  %v575_v62 = vmul.f32 (%p539_p1), %v2843_v60, %v2843_v60 }
  0xb0   : > { %v574_v63 = vmul.f32 (%p539_p1), %v2845_v61, %v2845_v61 }
  0xb1   : > { %582 = vadd.xlane.f32.xlu1 (%p539_p1), %v563_v38  ;;  %578 = vadd.xlane.f32.xlu0 (%p539_p1), %v561_v39 }
  0xb5   : > { %586 = vadd.xlane.f32.xlu1 %v565_v42  ;;  %584 = vadd.xlane.f32.xlu0 %v564_v43 }
  0xb9   : > { %590 = vadd.xlane.f32.xlu1 %v567_v46  ;;  %588 = vadd.xlane.f32.xlu0 %v566_v47 }
  0xbd   : > { %594 = vadd.xlane.f32.xlu1 %v569_v50  ;;  %592 = vadd.xlane.f32.xlu0 %v568_v51 }
  0xc1   : > { %598 = vadd.xlane.f32.xlu1 %v571_v54  ;;  %596 = vadd.xlane.f32.xlu0 %v570_v55 }
  0xc5   : > { %602 = vadd.xlane.f32.xlu1 %v573_v58  ;;  %600 = vadd.xlane.f32.xlu0 %v572_v59 }
  0xc9   : > { %606 = vadd.xlane.f32.xlu1 %v575_v62  ;;  %604 = vadd.xlane.f32.xlu0 %v574_v63 }
 0x13a   : > { %v581_v0 = vpop.xlane.xlu1 %580  ;;  %v577_v1 = vpop.xlane.xlu0 %576 }
 0x13b   : > { %v610_v2 = vadd.f32 1e-12, %v581_v0  ;;  %v608_v3 = vadd.f32 1e-12, %v577_v1 }
 0x13d   : > { %2232 = vrsqrt.f32 %v610_v2 }
 0x13e   : > { %2234 = vrsqrt.f32 %v608_v3  ;;  %v583_v4 = vpop.xlane.xlu1 %582  ;;  %v579_v5 = vpop.xlane.xlu0 %578 }
 0x13f   : > { %v611_v6 = vadd.f32 1e-12, %v583_v4  ;;  %v609_v7 = vadd.f32 1e-12, %v579_v5 }
 0x141   : > { %2236 = vrsqrt.f32 %v611_v6 }
 0x142   : > { %2238 = vrsqrt.f32 %v609_v7  ;;  %v587_v8 = vpop.xlane.xlu1 %586  ;;  %v585_v9 = vpop.xlane.xlu0 %584 }
 0x143   : > { %v613_v10 = vadd.f32 1e-12, %v587_v8  ;;  %v612_v11 = vadd.f32 1e-12, %v585_v9 }
 0x145   : > { %2240 = vrsqrt.f32 %v613_v10 }
 0x146   : > { %2242 = vrsqrt.f32 %v612_v11  ;;  %v591_v12 = vpop.xlane.xlu1 %590  ;;  %v589_v13 = vpop.xlane.xlu0 %588 }
 0x147   : > { %v2233_v14 = vpop.eup %2232  ;;  %v615_v15 = vadd.f32 1e-12, %v591_v12  ;;  %v614_v16 = vadd.f32 1e-12, %v589_v13 }
 0x148   : > { %v2235_v17 = vpop.eup %2234  ;;  %v642_v18 = vmul.f32 %v2233_v14, %v2787_v32 }
 0x149   : > { %v640_v19 = vmul.f32 %v2235_v17, %v2789_v33  ;;  %2244 = vrsqrt.f32 %v615_v15 }
 0x14a   : > { %658 = vst [vmem:[#allocation2 + $0x10] sm:$0xff] %v642_v18  ;;  %2246 = vrsqrt.f32 %v614_v16  ;;  %v595_v20 = vpop.xlane.xlu1 %594  ;;  %v593_v21 = vpop.xlane.xlu0 %592 }
 0x14b   : > { %v2237_v22 = vpop.eup %2236  ;;  %656 = vst [vmem:[#allocation2] sm:$0xff] %v640_v19  ;;  %v617_v23 = vadd.f32 1e-12, %v595_v20  ;;  %v616_v24 = vadd.f32 1e-12, %v593_v21 }
 0x14c   : > { %v2239_v25 = vpop.eup %2238  ;;  %v643_v26 = vmul.f32 %v2237_v22, %v2791_v34 }
 0x14d   : > { %v641_v27 = vmul.f32 %v2239_v25, %v2797_v37  ;;  %2248 = vrsqrt.f32 %v617_v23 }
 0x14e   : > { %659 = vst [vmem:[#allocation2 + $0x18] sm:$0xff] %v643_v26  ;;  %2250 = vrsqrt.f32 %v616_v24  ;;  %v599_v28 = vpop.xlane.xlu1 %598  ;;  %v597_v29 = vpop.xlane.xlu0 %596 }
 0x14f   : > { %v2241_v30 = vpop.eup %2240  ;;  %657 = vst [vmem:[#allocation2 + $0x8] sm:$0xff] %v641_v27  ;;  %v619_v31 = vadd.f32 1e-12, %v599_v28  ;;  %v618_v32 = vadd.f32 1e-12, %v597_v29 }
 0x150   : > { %v2243_v33 = vpop.eup %2242  ;;  %v645_v35 = vmul.f32 %v2241_v30, %v2803_v40 }
 0x151   : > { %v644_v36 = vmul.f32 %v2243_v33, %v2805_v41  ;;  %2252 = vrsqrt.f32 %v619_v31 }
 0x152   : > { %661 = vst [vmem:[#allocation2 + $0x28] sm:$0xff] %v645_v35  ;;  %2254 = vrsqrt.f32 %v618_v32  ;;  %v603_v34 = vpop.xlane.xlu1 %602  ;;  %v601_v38 = vpop.xlane.xlu0 %600 }
 0x153   : > { %v2245_v37 = vpop.eup %2244  ;;  %660 = vst [vmem:[#allocation2 + $0x20] sm:$0xff] %v644_v36  ;;  %v621_v39 = vadd.f32 1e-12, %v603_v34  ;;  %v620_v42 = vadd.f32 1e-12, %v601_v38 }
 0x154   : > { %v2247_v43 = vpop.eup %2246  ;;  %v647_v46 = vmul.f32 %v2245_v37, %v2811_v44 }
 0x155   : > { %v646_v47 = vmul.f32 %v2247_v43, %v2813_v45  ;;  %2256 = vrsqrt.f32 %v621_v39 }
 0x156   : > { %663 = vst [vmem:[#allocation2 + $0x38] sm:$0xff] %v647_v46  ;;  %2258 = vrsqrt.f32 %v620_v42  ;;  %v607_v40 = vpop.xlane.xlu1 %606  ;;  %v605_v50 = vpop.xlane.xlu0 %604 }
 0x157   : > { %v2249_v41 = vpop.eup %2248  ;;  %662 = vst [vmem:[#allocation2 + $0x30] sm:$0xff] %v646_v47  ;;  %v623_v51 = vadd.f32 1e-12, %v607_v40  ;;  %v622_v54 = vadd.f32 1e-12, %v605_v50 }
 0x158   : > { %v2251_v55 = vpop.eup %2250  ;;  %v649_v58 = vmul.f32 %v2249_v41, %v2819_v48 }
 0x159   : > { %v648_v59 = vmul.f32 %v2251_v55, %v2821_v49  ;;  %2260 = vrsqrt.f32 %v623_v51 }
 0x15a   : > { %665 = vst [vmem:[#allocation2 + $0x48] sm:$0xff] %v649_v58  ;;  %2262 = vrsqrt.f32 %v622_v54 }
 0x15b   : > { %v2253_v44 = vpop.eup %2252  ;;  %664 = vst [vmem:[#allocation2 + $0x40] sm:$0xff] %v648_v59 }
 0x15c   : > { %v2255_v45 = vpop.eup %2254  ;;  %v651_v62 = vmul.f32 %v2253_v44, %v2827_v52 }
 0x15d   : > { %v650_v63 = vmul.f32 %v2255_v45, %v2829_v53 }
 0x15e   : > { %667 = vst [vmem:[#allocation2 + $0x58] sm:$0xff] %v651_v62 }
 0x15f   : > { %v2257_v0 = vpop.eup %2256  ;;  %666 = vst [vmem:[#allocation2 + $0x50] sm:$0xff] %v650_v63 }
 0x160   : > { %v2259_v1 = vpop.eup %2258  ;;  %v653_v2 = vmul.f32 %v2257_v0, %v2835_v56 }
 0x161   : > { %v652_v48 = vmul.f32 %v2259_v1, %v2837_v57 }
 0x162   : > { %669 = vst [vmem:[#allocation2 + $0x68] sm:$0xff] %v653_v2 }
 0x163   : > { %v2261_v49 = vpop.eup %2260  ;;  %668 = vst [vmem:[#allocation2 + $0x60] sm:$0xff] %v652_v48 }
 0x164   : > { %v2263_v3 = vpop.eup %2262  ;;  %v655_v4 = vmul.f32 %v2261_v49, %v2843_v60 }
 0x165   : > { %v654_v5 = vmul.f32 %v2263_v3, %v2845_v61 }
 0x166   : > { %671 = vst [vmem:[#allocation2 + $0x78] sm:$0xff] %v655_v4 }
 0x167   : > { %670 = vst [vmem:[#allocation2 + $0x70] sm:$0xff] %v654_v5 }
 0x168 PF: > { %p1672_p12 = scmp.ge.s32.totalorder %s2468_s24, 2 }
 0x169   : > { %v2868_v52 = vld [vmem:[#allocation2] sm:$0xff] (!%p1672_p12)  ;;  %v2870_v53 = vld [vmem:[#allocation2 + $0x8] sm:$0xff] (!%p1672_p12)  ;;  %v2872_v56 = vld [vmem:[#allocation2 + $0x10] sm:$0xff] (!%p1672_p12) }
 0x16a   : > { %674 = sbr.rel (%p1672_p12) target bundleno = 1077 (0x435), region = 76  ;;  %v724_v57 = vpack.c.bf16 (!%p1672_p12), %v2870_v53, %v2868_v52  ;;  %v2876_v6 = vld [vmem:[#allocation2 + $0x18] sm:$0xff] (!%p1672_p12)  ;;  %v2880_v61 = vld [vmem:[#allocation2 + $0x20] sm:$0xff] (!%p1672_p12)  ;;  %v2882_v7 = vld [vmem:[#allocation2 + $0x28] sm:$0xff] (!%p1672_p12) }
 0x16b   : > { %v725_v60 = vpack.c.bf16 (!%p1672_p12), %v2876_v6, %v2872_v56  ;;  %v2884_v8 = vld [vmem:[#allocation2 + $0x30] sm:$0xff] (!%p1672_p12)  ;;  %v726_v9 = vpack.c.bf16 (!%p1672_p12), %v2882_v7, %v2880_v61  ;;  %v2888_v10 = vld [vmem:[#allocation2 + $0x38] sm:$0xff] (!%p1672_p12)  ;;  %v2264_v11 = vld [vmem:[#allocation4] sm:$0xff] (!%p1672_p12)  }
 0x16c   : > { %1805 = vmatprep.subr.bf16.mxu0 (!%p1672_p12), %v724_v57  ;;  %1821 = vmatprep.mubr.bf16.mxu0 (!%p1672_p12), %v2264_v11  ;;  %v727_v12 = vpack.c.bf16 (!%p1672_p12), %v2888_v10, %v2884_v8  ;;  %v2892_v13 = vld [vmem:[#allocation2 + $0x40] sm:$0xff] (!%p1672_p12)  ;;  %v2894_v14 = vld [vmem:[#allocation2 + $0x48] sm:$0xff] (!%p1672_p12)  ;;  %v2898_v16 = vld [vmem:[#allocation2 + $0x50] sm:$0xff] (!%p1672_p12) }
 0x16d   : > { %1806 = vmatpush3.bf16.msra.mxu0 (!%p1672_p12), %v724_v57  ;;  %v728_v15 = vpack.c.bf16 (!%p1672_p12), %v2894_v14, %v2892_v13  ;;  %v893_v17 = vld [vmem:[%s2763_s17] sm:$0xff] (!%p1672_p12)  ;;  %v894_v18 = vld [vmem:[%s2763_s17 + $0x8] sm:$0xff] (!%p1672_p12)  ;;  %v2902_v19 = vld [vmem:[#allocation2 + $0x58] sm:$0xff] (!%p1672_p12) }
 0x16e   : > { %1807 = vmatprep.subr.bf16.mxu0 (!%p1672_p12), %v725_v60  ;;  %v2005_v20 = vpack.c.bf16 (!%p1672_p12), %v894_v18, %v893_v17  ;;  %v895_v21 = vld [vmem:[%s2763_s17 + $0x10] sm:$0xff] (!%p1672_p12)  ;;  %v896_v22 = vld [vmem:[%s2763_s17 + $0x18] sm:$0xff] (!%p1672_p12)  ;;  %v897_v24 = vld [vmem:[%s2763_s17 + $0x20] sm:$0xff] (!%p1672_p12)  ;;  %v729_v26 = vpack.c.bf16 (!%p1672_p12), %v2902_v19, %v2898_v16 }
 0x16f   : > { %v2009_v23 = vpack.c.bf16 (!%p1672_p12), %v896_v22, %v895_v21  ;;  %v898_v25 = vld [vmem:[%s2763_s17 + $0x28] sm:$0xff] (!%p1672_p12)  ;;  %v2910_v27 = vld [vmem:[#allocation2 + $0x60] sm:$0xff] (!%p1672_p12)  ;;  %v899_v30 = vld [vmem:[%s2763_s17 + $0x30] sm:$0xff] (!%p1672_p12) }
 0x170   : > { %2006 = vmatprep.subr.bf16.mxu1 (!%p1672_p12), %v2005_v20  ;;  %v2912_v28 = vld [vmem:[#allocation2 + $0x68] sm:$0xff] (!%p1672_p12)  ;;  %v2013_v29 = vpack.c.bf16 (!%p1672_p12), %v898_v25, %v897_v24  ;;  %v900_v31 = vld [vmem:[%s2763_s17 + $0x38] sm:$0xff] (!%p1672_p12)  ;;  %v2918_v33 = vld [vmem:[#allocation2 + $0x70] sm:$0xff] (!%p1672_p12) }
 0x171   : > { %1808 = vmatpush3.bf16.msra.mxu0 %v725_v60  ;;  %2008 = vmatpush3.bf16.msra.mxu1 %v2005_v20  ;;  %v730_v32 = vpack.c.bf16 %v2912_v28, %v2910_v27  ;;  %v2920_v35 = vld [vmem:[#allocation2 + $0x78] sm:$0xff]  ;;  %v2017_v36 = vpack.c.bf16 %v900_v31, %v899_v30  ;;  %v901_v34 = vld [vmem:[%s2763_s17 + $0x40] sm:$0xff]  ;;  %v902_v38 = vld [vmem:[%s2763_s17 + $0x48] sm:$0xff] }
 0x172   : > { %1809 = vmatprep.subr.bf16.mxu0 %v726_v9  ;;  %2010 = vmatprep.subr.bf16.mxu1 %v2009_v23  ;;  %v731_v37 = vpack.c.bf16 %v2920_v35, %v2918_v33  ;;  %v2021_v39 = vpack.c.bf16 %v902_v38, %v901_v34  ;;  %v903_v42 = vld [vmem:[%s2763_s17 + $0x50] sm:$0xff]  ;;  %v904_v43 = vld [vmem:[%s2763_s17 + $0x58] sm:$0xff]  ;;  %v2265_v47 = vld [vmem:[#allocation4 + $0x8] sm:$0xff]  }
 0x173   : > { %v2025_v46 = vpack.c.bf16 %v904_v43, %v903_v42  ;;  %v905_v40 = vld [vmem:[%s2763_s17 + $0x60] sm:$0xff]  ;;  %v906_v50 = vld [vmem:[%s2763_s17 + $0x68] sm:$0xff]  ;;  %v2266_v41 = vld [vmem:[#allocation4 + $0x10] sm:$0xff]  }
 0x174   : > { %v2029_v51 = vpack.c.bf16 %v906_v50, %v905_v40  ;;  %v2267_v54 = vld [vmem:[#allocation4 + $0x18] sm:$0xff]   ;;  %v2268_v55 = vld [vmem:[#allocation4 + $0x20] sm:$0xff]   ;;  %v2269_v58 = vld [vmem:[#allocation4 + $0x28] sm:$0xff]  }
 0x175   : > { %1810 = vmatpush3.bf16.msra.mxu0 %v726_v9  ;;  %2012 = vmatpush3.bf16.msra.mxu1 %v2009_v23  ;;  %v2270_v59 = vld [vmem:[#allocation4 + $0x30] sm:$0xff]   ;;  %v2271_v44 = vld [vmem:[#allocation4 + $0x38] sm:$0xff]   ;;  %v1077_v0 = vld [vmem:[%s2782_s28] sm:$0xff] }
 0x176   : > { %1811 = vmatprep.subr.bf16.mxu0 %v727_v12  ;;  %2014 = vmatprep.subr.bf16.mxu1 %v2013_v29  ;;  %v907_v45 = vld [vmem:[%s2763_s17 + $0x70] sm:$0xff]  ;;  %v908_v62 = vld [vmem:[%s2763_s17 + $0x78] sm:$0xff]  ;;  %v1078_v1 = vld [vmem:[%s2782_s28 + $0x8] sm:$0xff] }
 0x177   : > { %v2033_v63 = vpack.c.bf16 %v908_v62, %v907_v45  ;;  %v1079_v2 = vld [vmem:[%s2782_s28 + $0x10] sm:$0xff]  ;;  %v2037_v48 = vpack.c.bf16 %v1078_v1, %v1077_v0  ;;  %v1080_v49 = vld [vmem:[%s2782_s28 + $0x18] sm:$0xff]  ;;  %v1081_v4 = vld [vmem:[%s2782_s28 + $0x20] sm:$0xff] }
 0x178   : > { %v2041_v3 = vpack.c.bf16 %v1080_v49, %v1079_v2  ;;  %v1082_v5 = vld [vmem:[%s2782_s28 + $0x28] sm:$0xff]  ;;  %v1083_v60 = vld [vmem:[%s2782_s28 + $0x30] sm:$0xff]  ;;  %v1084_v9 = vld [vmem:[%s2782_s28 + $0x38] sm:$0xff] }
 0x179   : > { %1812 = vmatpush3.bf16.msra.mxu0 %v727_v12  ;;  %2016 = vmatpush3.bf16.msra.mxu1 %v2013_v29  ;;  %v2045_v57 = vpack.c.bf16 %v1082_v5, %v1081_v4  ;;  %v2049_v11 = vpack.c.bf16 %v1084_v9, %v1083_v60  ;;  %v1085_v12 = vld [vmem:[%s2782_s28 + $0x40] sm:$0xff]  ;;  %v1087_v18 = vld [vmem:[%s2782_s28 + $0x50] sm:$0xff]  ;;  %v1088_v20 = vld [vmem:[%s2782_s28 + $0x58] sm:$0xff] }
 0x17a   : > { %1813 = vmatprep.subr.bf16.mxu0 %v728_v15  ;;  %2018 = vmatprep.subr.bf16.mxu1 %v2017_v36  ;;  %v2057_v21 = vpack.c.bf16 %v1088_v20, %v1087_v18  ;;  %v1089_v22 = vld [vmem:[%s2782_s28 + $0x60] sm:$0xff]  ;;  %v1090_v23 = vld [vmem:[%s2782_s28 + $0x68] sm:$0xff] }
 0x17b   : > { %v2061_v24 = vpack.c.bf16 %v1090_v23, %v1089_v22 }
 0x17d   : > { %1814 = vmatpush3.bf16.msra.mxu0 %v728_v15  ;;  %2020 = vmatpush3.bf16.msra.mxu1 %v2017_v36  ;;  %v1086_v15 = vld [vmem:[%s2782_s28 + $0x48] sm:$0xff] }
 0x17e   : > { %1815 = vmatprep.subr.bf16.mxu0 %v729_v26  ;;  %2022 = vmatprep.subr.bf16.mxu1 %v2021_v39  ;;  %v2053_v17 = vpack.c.bf16 %v1086_v15, %v1085_v12 }
 0x181   : > { %1816 = vmatpush3.bf16.msra.mxu0 %v729_v26  ;;  %2024 = vmatpush3.bf16.msra.mxu1 %v2021_v39 }
 0x182   : > { %1817 = vmatprep.subr.bf16.mxu0 %v730_v32  ;;  %2026 = vmatprep.subr.bf16.mxu1 %v2025_v46 }
 0x185   : > { %1818 = vmatpush3.bf16.msra.mxu0 %v730_v32  ;;  %2028 = vmatpush3.bf16.msra.mxu1 %v2025_v46 }
 0x186   : > { %1819 = vmatprep.subr.bf16.mxu0 %v731_v37  ;;  %2030 = vmatprep.subr.bf16.mxu1 %v2029_v51 }
 0x189   : > { %1820 = vmatpush3.bf16.msra.mxu0 %v731_v37  ;;  %2032 = vmatpush3.bf16.msra.mxu1 %v2029_v51 }
 0x18a   : > { %2034 = vmatprep.subr.bf16.mxu1 %v2033_v63  ;;  %2038 = vmatprep.subr.bf16.mxu0 %v2037_v48 }
 0x18c   : > { %1822 = vmatmul.mubr.bf16.vlgmr.msra.gmra.mrb[0].mxu0 %v2265_v47 }
 0x18d   : > { %1825 = vmatprep.mubr.bf16.mxu0 %v2266_v41  ;;  %2036 = vmatpush3.bf16.msra.mxu1 %v2033_v63 }
 0x18e   : > { %2101 = vmatprep.subr.bf16.mxu1 %v2037_v48  ;;  %2040 = vmatpush3.bf16.msra.mxu0 %v2037_v48 }
 0x18f   : > { %2042 = vmatprep.subr.bf16.mxu0 %v2041_v3 }
 0x192   : > { %2044 = vmatpush3.bf16.msra.mxu0 %v2041_v3 }
 0x193   : > { %2046 = vmatprep.subr.bf16.mxu0 %v2045_v57 }
 0x194   : > { %1826 = vmatmul.mubr.bf16.gmra.mrb[4].mxu0 %v2267_v54 }
 0x195   : > { %1829 = vmatprep.mubr.bf16.mxu0 %v2268_v55  ;;  %v1091_v55 = vld [vmem:[%s2782_s28 + $0x70] sm:$0xff] }
 0x196   : > { %2048 = vmatpush3.bf16.msra.mxu0 %v2045_v57 }
 0x197   : > { %2050 = vmatprep.subr.bf16.mxu0 %v2049_v11 }
 0x19a   : > { %2052 = vmatpush3.bf16.msra.mxu0 %v2049_v11 }
 0x19b   : > { %2054 = vmatprep.subr.bf16.mxu0 %v2053_v17 }
 0x19c   : > { %1830 = vmatmul.mubr.bf16.gmra.mrb[8].mxu0 %v2269_v58  ;;  %v1092_v58 = vld [vmem:[%s2782_s28 + $0x78] sm:$0xff] }
 0x19d   : > { %1833 = vmatprep.mubr.bf16.mxu0 %v2270_v59 }
 0x19e   : > { %2056 = vmatpush3.bf16.msra.mxu0 %v2053_v17 }
 0x19f   : > { %2058 = vmatprep.subr.bf16.mxu0 %v2057_v21 }
 0x1a2   : > { %2060 = vmatpush3.bf16.msra.mxu0 %v2057_v21 }
 0x1a3   : > { %2062 = vmatprep.subr.bf16.mxu0 %v2061_v24 }
 0x1a4   : > { %1834 = vmatmul.mubr.bf16.gmra.mrb[12].mxu0 %v2271_v44 }
 0x1a6   : > { %2064 = vmatpush3.bf16.msra.mxu0 %v2061_v24 }
 0x25f   : > { %v1823_v25 = vpop.f32.mrb[0].mxu0 }
 0x260   : > { %v814_v26 = vpop.f32.mrb[1].mxu0  ;;  %v879_v36 = vadd.f32 %v1823_v25, %v2872_v56 }
 0x261   : > { %v1824_v29 = vpop.f32.mrb[2].mxu0  ;;  %v877_v30 = vadd.f32 %v814_v26, %v2868_v52 }
 0x262   : > { %v817_v31 = vpop.f32.mrb[3].mxu0  ;;  %v880_v34 = vadd.f32 %v1824_v29, %v2876_v6 }
 0x263   : > { %v878_v32 = vadd.f32 %v817_v31, %v2870_v53  ;;  %1869 = vmatprep.mubr.f32.mxu1 %v877_v30 }
 0x265   : > { %1870 = vmatmul.mubr.f32.vlgmr.msra.gmra.mrb[0].mxu1 %v878_v32 }
 0x266   : > { %1872 = vmatprep.mubr.f32.mxu1 %v879_v36  ;;  %2109 = vmatpush3.bf16.msra.mxu1 %v2037_v48 }
 0x267   : > { %v1827_v38 = vpop.f32.mrb[4].mxu0  ;;  %2102 = vmatprep.subr.bf16.mxu1 %v2041_v3 }
 0x268   : > { %v830_v37 = vpop.f32.mrb[5].mxu0  ;;  %v883_v53 = vadd.f32 %v1827_v38, %v2884_v8 }
 0x269   : > { %v881_v39 = vadd.f32 %v830_v37, %v2880_v61  ;;  %v1828_v42 = vpop.f32.mrb[6].mxu0  ;;  %1873 = vmatmul.mubr.f32.gmra.mrb[2].mxu1 %v880_v34 }
 0x26a   : > { %v833_v43 = vpop.f32.mrb[7].mxu0  ;;  %2110 = vmatpush3.bf16.msra.mxu1 %v2041_v3  ;;  %v884_v56 = vadd.f32 %v1828_v42, %v2888_v10 }
 0x26b   : > { %v882_v52 = vadd.f32 %v833_v43, %v2882_v7  ;;  %1875 = vmatprep.mubr.f32.mxu1 %v881_v39  ;;  %2103 = vmatprep.subr.bf16.mxu1 %v2045_v57 }
 0x26d   : > { %1876 = vmatmul.mubr.f32.gmra.mrb[4].mxu1 %v882_v52 }
 0x26e   : > { %1878 = vmatprep.mubr.f32.mxu1 %v883_v53  ;;  %2111 = vmatpush3.bf16.msra.mxu1 %v2045_v57 }
 0x26f   : > { %v1831_v6 = vpop.f32.mrb[8].mxu0  ;;  %2104 = vmatprep.subr.bf16.mxu1 %v2049_v11 }
 0x270   : > { %v846_v46 = vpop.f32.mrb[9].mxu0  ;;  %v887_v8 = vadd.f32 %v1831_v6, %v2898_v16 }
 0x271   : > { %v885_v61 = vadd.f32 %v846_v46, %v2892_v13  ;;  %v1832_v47 = vpop.f32.mrb[10].mxu0  ;;  %1879 = vmatmul.mubr.f32.gmra.mrb[6].mxu1 %v884_v56 }
 0x272   : > { %v849_v40 = vpop.f32.mrb[11].mxu0  ;;  %2112 = vmatpush3.bf16.msra.mxu1 %v2049_v11  ;;  %v888_v10 = vadd.f32 %v1832_v47, %v2902_v19 }
 0x273   : > { %v886_v7 = vadd.f32 %v849_v40, %v2894_v14  ;;  %1881 = vmatprep.mubr.f32.mxu1 %v885_v61  ;;  %2105 = vmatprep.subr.bf16.mxu1 %v2053_v17  ;;  %v1682_v40 = vld [vmem:[%s453_s10] ss:$0 sm:$0xff] }
 0x275   : > { %1882 = vmatmul.mubr.f32.gmra.mrb[8].mxu1 %v886_v7 }
 0x276   : > { %1884 = vmatprep.mubr.f32.mxu1 %v887_v8  ;;  %2113 = vmatpush3.bf16.msra.mxu1 %v2053_v17 }
 0x277   : > { %v1835_v50 = vpop.f32.mrb[12].mxu0  ;;  %2106 = vmatprep.subr.bf16.mxu1 %v2057_v21 }
 0x278   : > { %v862_v41 = vpop.f32.mrb[13].mxu0  ;;  %v891_v16 = vadd.f32 %v1835_v50, %v2918_v33 }
 0x279   : > { %v889_v13 = vadd.f32 %v862_v41, %v2910_v27  ;;  %v1836_v51 = vpop.f32.mrb[14].mxu0  ;;  %1885 = vmatmul.mubr.f32.gmra.mrb[10].mxu1 %v888_v10  ;;  %v2065_v27 = vpack.c.bf16 %v1092_v58, %v1091_v55 }
 0x27a   : > { %v865_v54 = vpop.f32.mrb[15].mxu0  ;;  %2114 = vmatpush3.bf16.msra.mxu1 %v2057_v21  ;;  %v892_v19 = vadd.f32 %v1836_v51, %v2920_v35 }
 0x27b   : > { %v890_v14 = vadd.f32 %v865_v54, %v2912_v28  ;;  %1887 = vmatprep.mubr.f32.mxu1 %v889_v13  ;;  %2107 = vmatprep.subr.bf16.mxu1 %v2061_v24  ;;  %v1681_v28 = vld [vmem:[%s444_s7] ss:$0 sm:$0xff] }
 0x27c   : > { %2066 = vmatprep.subr.bf16.mxu0 %v2065_v27 }
 0x27d   : > { %1888 = vmatmul.mubr.f32.gmra.mrb[12].mxu1 %v890_v14  ;;  %2068 = vmatpush3.bf16.msra.mxu0 %v2065_v27 }
 0x27e   : > { %1890 = vmatprep.mubr.f32.mxu1 %v891_v16  ;;  %2115 = vmatpush3.bf16.msra.mxu1 %v2061_v24 }
 0x27f   : > { %2108 = vmatprep.subr.bf16.mxu1 %v2065_v27 }
 0x281   : > { %1891 = vmatmul.mubr.f32.gmra.mrb[14].mxu1 %v892_v19 }
 0x282   : > { %2116 = vmatpush3.bf16.msra.mxu1 %v2065_v27 }
 0x338   : > { %v1871_v59 = vpop.f32.mrb[0].mxu1 }
 0x339   : > { %v988_v33 = vadd.f32 %v1871_v59, %v1681_v28  ;;  %v982_v44 = vpop.f32.mrb[1].mxu1 }
 0x33a   : > { %v983_v45 = vadd.f32 %v1681_v28, %v982_v44 }
 0x33b   : > { %v1062_v35 = vmax.f32 %v988_v33, 0.0 }
 0x33c   : > { %v1061_v62 = vmax.f32 %v983_v45, 0.0  ;;  %v1874_v63 = vpop.f32.mrb[2].mxu1 }
 0x33d   : > { %v998_v0 = vadd.f32 %v1874_v63, %v1681_v28  ;;  %v992_v1 = vpop.f32.mrb[3].mxu1 }
 0x33e   : > { %v993_v2 = vadd.f32 %v1681_v28, %v992_v1  ;;  %1925 = vmatprep.mubr.f32.mxu0 %v1061_v62 }
 0x33f   : > { %1926 = vmatmul.mubr.f32.vlgmr.msra.gmra.mrb[16].mxu0 %v1062_v35  ;;  %v1064_v3 = vmax.f32 %v998_v0, 0.0 }
 0x340   : > { %v1063_v48 = vmax.f32 %v993_v2, 0.0  ;;  %v1877_v49 = vpop.f32.mrb[4].mxu1 }
 0x341   : > { %v1008_v4 = vadd.f32 %v1877_v49, %v1681_v28  ;;  %v1002_v5 = vpop.f32.mrb[5].mxu1 }
 0x342   : > { %v1003_v57 = vadd.f32 %v1681_v28, %v1002_v5  ;;  %1928 = vmatprep.mubr.f32.mxu0 %v1063_v48 }
 0x343   : > { %1929 = vmatmul.mubr.f32.gmra.mrb[18].mxu0 %v1064_v3  ;;  %v1066_v11 = vmax.f32 %v1008_v4, 0.0 }
 0x344   : > { %v1065_v60 = vmax.f32 %v1003_v57, 0.0  ;;  %v1880_v9 = vpop.f32.mrb[6].mxu1 }
 0x345   : > { %v1018_v12 = vadd.f32 %v1880_v9, %v1681_v28  ;;  %v1012_v15 = vpop.f32.mrb[7].mxu1 }
 0x346   : > { %v1013_v17 = vadd.f32 %v1681_v28, %v1012_v15  ;;  %1931 = vmatprep.mubr.f32.mxu0 %v1065_v60 }
 0x347   : > { %1932 = vmatmul.mubr.f32.gmra.mrb[20].mxu0 %v1066_v11  ;;  %v1068_v21 = vmax.f32 %v1018_v12, 0.0 }
 0x348   : > { %v1067_v18 = vmax.f32 %v1013_v17, 0.0  ;;  %v1883_v20 = vpop.f32.mrb[8].mxu1 }
 0x349   : > { %v1028_v22 = vadd.f32 %v1883_v20, %v1681_v28  ;;  %v1022_v23 = vpop.f32.mrb[9].mxu1 }
 0x34a   : > { %v1023_v24 = vadd.f32 %v1681_v28, %v1022_v23  ;;  %1934 = vmatprep.mubr.f32.mxu0 %v1067_v18 }
 0x34b   : > { %1935 = vmatmul.mubr.f32.gmra.mrb[22].mxu0 %v1068_v21  ;;  %v1070_v29 = vmax.f32 %v1028_v22, 0.0 }
 0x34c   : > { %v1069_v25 = vmax.f32 %v1023_v24, 0.0  ;;  %v1886_v26 = vpop.f32.mrb[10].mxu1 }
 0x34d   : > { %v1038_v30 = vadd.f32 %v1886_v26, %v1681_v28  ;;  %v1032_v31 = vpop.f32.mrb[11].mxu1 }
 0x34e   : > { %v1033_v32 = vadd.f32 %v1681_v28, %v1032_v31  ;;  %1937 = vmatprep.mubr.f32.mxu1 %v1069_v25 }
 0x34f   : > { %1938 = vmatmul.mubr.f32.vlgmr.msra.gmra.mrb[16].mxu1 %v1070_v29  ;;  %v1072_v38 = vmax.f32 %v1038_v30, 0.0 }
 0x350   : > { %v1071_v36 = vmax.f32 %v1033_v32, 0.0  ;;  %v1889_v34 = vpop.f32.mrb[12].mxu1 }
 0x351   : > { %v1048_v37 = vadd.f32 %v1889_v34, %v1681_v28  ;;  %v1042_v39 = vpop.f32.mrb[13].mxu1 }
 0x352   : > { %v1043_v42 = vadd.f32 %v1681_v28, %v1042_v39  ;;  %1940 = vmatprep.mubr.f32.mxu1 %v1071_v36 }
 0x353   : > { %1941 = vmatmul.mubr.f32.gmra.mrb[18].mxu1 %v1072_v38  ;;  %v1074_v53 = vmax.f32 %v1048_v37, 0.0 }
 0x354   : > { %v1073_v43 = vmax.f32 %v1043_v42, 0.0  ;;  %v1892_v52 = vpop.f32.mrb[14].mxu1 }
 0x355   : > { %v1058_v56 = vadd.f32 %v1892_v52, %v1681_v28  ;;  %v1052_v6 = vpop.f32.mrb[15].mxu1 }
 0x356   : > { %v1053_v46 = vadd.f32 %v1681_v28, %v1052_v6  ;;  %1943 = vmatprep.mubr.f32.mxu1 %v1073_v43 }
 0x357   : > { %1944 = vmatmul.mubr.f32.gmra.mrb[20].mxu1 %v1074_v53  ;;  %v1076_v47 = vmax.f32 %v1058_v56, 0.0 }
 0x358   : > { %v1075_v61 = vmax.f32 %v1053_v46, 0.0 }
 0x35a   : > { %1946 = vmatprep.mubr.f32.mxu1 %v1075_v61 }
 0x35b   : > { %1947 = vmatmul.mubr.f32.gmra.mrb[22].mxu1 %v1076_v47 }
 0x412   : > { %v1927_v7 = vpop.f32.mrb[16].mxu0 }
 0x413   : > { %v1172_v8 = vadd.f32 %v1927_v7, %v1682_v40  ;;  %v1166_v10 = vpop.f32.mrb[17].mxu0 }
 0x414   : > { %v1167_v50 = vadd.f32 %v1682_v40, %v1166_v10 }
 0x415   : > { %v1246_v41 = vmax.f32 %v1172_v8, 0.0 }
 0x416   : > { %v1245_v13 = vmax.f32 %v1167_v50, 0.0  ;;  %v1930_v51 = vpop.f32.mrb[18].mxu0 }
 0x417   : > { %1263 = vst [vmem:[#allocation3 + $0x8] sm:$0xff] %v1246_v41  ;;  %v1182_v54 = vadd.f32 %v1930_v51, %v1682_v40  ;;  %v1176_v14 = vpop.f32.mrb[19].mxu0 }
 0x418   : > { %1262 = vst [vmem:[#allocation3] sm:$0xff] %v1245_v13  ;;  %v1177_v16 = vadd.f32 %v1682_v40, %v1176_v14 }
 0x419   : > { %v1248_v19 = vmax.f32 %v1182_v54, 0.0 }
 0x41a   : > { %v1247_v55 = vmax.f32 %v1177_v16, 0.0  ;;  %v1933_v58 = vpop.f32.mrb[20].mxu0 }
 0x41b   : > { %1265 = vst [vmem:[#allocation3 + $0x18] sm:$0xff] %v1248_v19  ;;  %v1192_v27 = vadd.f32 %v1933_v58, %v1682_v40  ;;  %v1186_v28 = vpop.f32.mrb[21].mxu0 }
 0x41c   : > { %1264 = vst [vmem:[#allocation3 + $0x10] sm:$0xff] %v1247_v55  ;;  %v1187_v59 = vadd.f32 %v1682_v40, %v1186_v28 }
 0x41d   : > { %v1250_v33 = vmax.f32 %v1192_v27, 0.0 }
 0x41e   : > { %v1249_v44 = vmax.f32 %v1187_v59, 0.0  ;;  %v1936_v45 = vpop.f32.mrb[22].mxu0 }
 0x41f   : > { %1267 = vst [vmem:[#allocation3 + $0x28] sm:$0xff] %v1250_v33  ;;  %v1202_v62 = vadd.f32 %v1936_v45, %v1682_v40  ;;  %v1196_v63 = vpop.f32.mrb[23].mxu0 }
 0x420   : > { %1266 = vst [vmem:[#allocation3 + $0x20] sm:$0xff] %v1249_v44  ;;  %v1197_v35 = vadd.f32 %v1682_v40, %v1196_v63 }
 0x421   : > { %v1252_v0 = vmax.f32 %v1202_v62, 0.0 }
 0x422   : > { %v1251_v1 = vmax.f32 %v1197_v35, 0.0  ;;  %v1939_v2 = vpop.f32.mrb[16].mxu1 }
 0x423   : > { %1269 = vst [vmem:[#allocation3 + $0x38] sm:$0xff] %v1252_v0  ;;  %v1212_v48 = vadd.f32 %v1939_v2, %v1682_v40  ;;  %v1206_v49 = vpop.f32.mrb[17].mxu1 }
 0x424   : > { %1268 = vst [vmem:[#allocation3 + $0x30] sm:$0xff] %v1251_v1  ;;  %v1207_v3 = vadd.f32 %v1682_v40, %v1206_v49 }
 0x425   : > { %v1254_v4 = vmax.f32 %v1212_v48, 0.0 }
 0x426   : > { %v1253_v5 = vmax.f32 %v1207_v3, 0.0  ;;  %v1942_v57 = vpop.f32.mrb[18].mxu1 }
 0x427   : > { %1271 = vst [vmem:[#allocation3 + $0x48] sm:$0xff] %v1254_v4  ;;  %v1222_v60 = vadd.f32 %v1942_v57, %v1682_v40  ;;  %v1216_v9 = vpop.f32.mrb[19].mxu1 }
 0x428   : > { %1270 = vst [vmem:[#allocation3 + $0x40] sm:$0xff] %v1253_v5  ;;  %v1217_v11 = vadd.f32 %v1682_v40, %v1216_v9 }
 0x429   : > { %v1256_v12 = vmax.f32 %v1222_v60, 0.0 }
 0x42a   : > { %v1255_v15 = vmax.f32 %v1217_v11, 0.0  ;;  %v1945_v17 = vpop.f32.mrb[20].mxu1 }
 0x42b   : > { %1273 = vst [vmem:[#allocation3 + $0x58] sm:$0xff] %v1256_v12  ;;  %v1232_v18 = vadd.f32 %v1945_v17, %v1682_v40  ;;  %v1226_v20 = vpop.f32.mrb[21].mxu1 }
 0x42c   : > { %1272 = vst [vmem:[#allocation3 + $0x50] sm:$0xff] %v1255_v15  ;;  %v1227_v21 = vadd.f32 %v1682_v40, %v1226_v20 }
 0x42d   : > { %v1258_v22 = vmax.f32 %v1232_v18, 0.0 }
 0x42e   : > { %v1257_v23 = vmax.f32 %v1227_v21, 0.0  ;;  %v1948_v24 = vpop.f32.mrb[22].mxu1 }
 0x42f   : > { %1275 = vst [vmem:[#allocation3 + $0x68] sm:$0xff] %v1258_v22  ;;  %v1242_v25 = vadd.f32 %v1948_v24, %v1682_v40  ;;  %v1236_v26 = vpop.f32.mrb[23].mxu1 }
 0x430   : > { %1274 = vst [vmem:[#allocation3 + $0x60] sm:$0xff] %v1257_v23  ;;  %v1237_v29 = vadd.f32 %v1682_v40, %v1236_v26 }
 0x431   : > { %v1260_v30 = vmax.f32 %v1242_v25, 0.0 }
 0x432   : > { %v1259_v31 = vmax.f32 %v1237_v29, 0.0 }
 0x433   : > { %1277 = vst [vmem:[#allocation3 + $0x78] sm:$0xff] %v1260_v30 }
 0x434   : > { %1276 = vst [vmem:[#allocation3 + $0x70] sm:$0xff] %v1259_v31 }
 0x435 PF: > { %p1683_p6 = scmp.ne.s32.totalorder %s2468_s24, 2 }
 0x436   : > { %v1298_v32 = vld [vmem:[#allocation2] sm:$0xff] (!%p1683_p6)  ;;  %v1299_v36 = vld [vmem:[#allocation2 + $0x8] sm:$0xff] (!%p1683_p6)  ;;  %v1300_v34 = vld [vmem:[#allocation2 + $0x10] sm:$0xff] (!%p1683_p6) }
 0x437   : > { %1280 = sbr.rel (%p1683_p6) target bundleno = 1371 (0x55b), region = 80  ;;  %v2069_v38 = vpack.c.bf16 (!%p1683_p6), %v1299_v36, %v1298_v32  ;;  %v1301_v37 = vld [vmem:[#allocation2 + $0x18] sm:$0xff] (!%p1683_p6)  ;;  %1981 = vmatprep.mubr.f32.mxu0 (!%p1683_p6), %v1298_v32  ;;  %v1306_v42 = vld [vmem:[#allocation2 + $0x40] sm:$0xff] (!%p1683_p6)  ;;  %v1303_v52 = vld [vmem:[#allocation2 + $0x28] sm:$0xff] (!%p1683_p6) }
 0x438   : > { %v2073_v39 = vpack.c.bf16 (!%p1683_p6), %v1301_v37, %v1300_v34  ;;  %v1302_v43 = vld [vmem:[#allocation2 + $0x20] sm:$0xff] (!%p1683_p6)  ;;  %1993 = vmatprep.mubr.f32.mxu1 (!%p1683_p6), %v1306_v42  ;;  %v1304_v56 = vld [vmem:[#allocation2 + $0x30] sm:$0xff] (!%p1683_p6)  ;;  %v1305_v6 = vld [vmem:[#allocation2 + $0x38] sm:$0xff] (!%p1683_p6) }
 0x439   : > { %2070 = vmatprep.subr.bf16.mxu0 (!%p1683_p6), %v2069_v38  ;;  %2117 = vmatprep.subr.bf16.mxu1 (!%p1683_p6), %v2069_v38  ;;  %v2077_v53 = vpack.c.bf16 (!%p1683_p6), %v1303_v52, %v1302_v43  ;;  %v2081_v46 = vpack.c.bf16 (!%p1683_p6), %v1305_v6, %v1304_v56  ;;  %v1307_v61 = vld [vmem:[#allocation2 + $0x48] sm:$0xff] (!%p1683_p6)  ;;  %v1308_v40 = vld [vmem:[#allocation2 + $0x50] sm:$0xff] (!%p1683_p6)  ;;  %v1309_v7 = vld [vmem:[#allocation2 + $0x58] sm:$0xff] (!%p1683_p6) }
 0x43a   : > { %2072 = vmatpush3.bf16.xpose.msra.mxu0 (!%p1683_p6), %v2069_v38  ;;  %2125 = vmatpush3.bf16.xpose.msra.mxu1 (!%p1683_p6), %v2069_v38  ;;  %v2085_v47 = vpack.c.bf16 (!%p1683_p6), %v1307_v61, %v1306_v42  ;;  %v2089_v8 = vpack.c.bf16 (!%p1683_p6), %v1309_v7, %v1308_v40  ;;  %v1310_v10 = vld [vmem:[#allocation2 + $0x60] sm:$0xff] (!%p1683_p6)  ;;  %v1311_v50 = vld [vmem:[#allocation2 + $0x68] sm:$0xff] (!%p1683_p6)  ;;  %v1312_v13 = vld [vmem:[#allocation2 + $0x70] sm:$0xff] (!%p1683_p6) }
 0x43b   : > { %2074 = vmatprep.subr.bf16.mxu0 (!%p1683_p6), %v2073_v39  ;;  %2118 = vmatprep.subr.bf16.mxu1 (!%p1683_p6), %v2073_v39  ;;  %v2093_v41 = vpack.c.bf16 (!%p1683_p6), %v1311_v50, %v1310_v10  ;;  %v1313_v51 = vld [vmem:[#allocation2 + $0x78] sm:$0xff] (!%p1683_p6) }
 0x43c   : > { %v2097_v54 = vpack.c.bf16 (!%p1683_p6), %v1313_v51, %v1312_v13 }
 0x442   : > { %2076 = vmatpush3.bf16.xpose.msra.mxu0 %v2073_v39  ;;  %2126 = vmatpush3.bf16.xpose.msra.mxu1 %v2073_v39 }
 0x443   : > { %2078 = vmatprep.subr.bf16.mxu0 %v2077_v53  ;;  %2119 = vmatprep.subr.bf16.mxu1 %v2077_v53 }
 0x44a   : > { %2080 = vmatpush3.bf16.xpose.msra.mxu0 %v2077_v53  ;;  %2127 = vmatpush3.bf16.xpose.msra.mxu1 %v2077_v53 }
 0x44b   : > { %2082 = vmatprep.subr.bf16.mxu0 %v2081_v46  ;;  %2120 = vmatprep.subr.bf16.mxu1 %v2081_v46 }
 0x452   : > { %2084 = vmatpush3.bf16.xpose.msra.mxu0 %v2081_v46  ;;  %2128 = vmatpush3.bf16.xpose.msra.mxu1 %v2081_v46 }
 0x453   : > { %2086 = vmatprep.subr.bf16.mxu0 %v2085_v47  ;;  %2121 = vmatprep.subr.bf16.mxu1 %v2085_v47 }
 0x45a   : > { %2088 = vmatpush3.bf16.xpose.msra.mxu0 %v2085_v47  ;;  %2129 = vmatpush3.bf16.xpose.msra.mxu1 %v2085_v47 }
 0x45b   : > { %2090 = vmatprep.subr.bf16.mxu0 %v2089_v8  ;;  %2122 = vmatprep.subr.bf16.mxu1 %v2089_v8 }
 0x462   : > { %2092 = vmatpush3.bf16.xpose.msra.mxu0 %v2089_v8  ;;  %2130 = vmatpush3.bf16.xpose.msra.mxu1 %v2089_v8 }
 0x463   : > { %2094 = vmatprep.subr.bf16.mxu0 %v2093_v41  ;;  %2123 = vmatprep.subr.bf16.mxu1 %v2093_v41 }
 0x46a   : > { %2096 = vmatpush3.bf16.xpose.msra.mxu0 %v2093_v41  ;;  %2131 = vmatpush3.bf16.xpose.msra.mxu1 %v2093_v41 }
 0x46b   : > { %2098 = vmatprep.subr.bf16.mxu0 %v2097_v54  ;;  %2124 = vmatprep.subr.bf16.mxu1 %v2097_v54 }
 0x472   : > { %2100 = vmatpush3.bf16.xpose.msra.mxu0 %v2097_v54  ;;  %2132 = vmatpush3.bf16.xpose.msra.mxu1 %v2097_v54 }
 0x479   : > { %1982 = vmatmul.mubr.f32.vlgmr.msra.gmra.mrb[0].mxu0 %v1299_v36  ;;  %1994 = vmatmul.mubr.f32.vlgmr.msra.gmra.mrb[0].mxu1 %v1307_v61 }
 0x47a   : > { %1984 = vmatprep.mubr.f32.mxu0 %v1300_v34  ;;  %1996 = vmatprep.mubr.f32.mxu1 %v1308_v40 }
 0x47d   : > { %1985 = vmatmul.mubr.f32.gmra.mrb[2].mxu0 %v1301_v37  ;;  %1997 = vmatmul.mubr.f32.gmra.mrb[2].mxu1 %v1309_v7 }
 0x47e   : > { %1987 = vmatprep.mubr.f32.mxu0 %v1302_v43  ;;  %1999 = vmatprep.mubr.f32.mxu1 %v1310_v10 }
 0x481   : > { %1988 = vmatmul.mubr.f32.gmra.mrb[4].mxu0 %v1303_v52  ;;  %2000 = vmatmul.mubr.f32.gmra.mrb[4].mxu1 %v1311_v50 }
 0x482   : > { %1990 = vmatprep.mubr.f32.mxu0 %v1304_v56  ;;  %2002 = vmatprep.mubr.f32.mxu1 %v1312_v13 }
 0x485   : > { %1991 = vmatmul.mubr.f32.gmra.mrb[6].mxu0 %v1305_v6  ;;  %2003 = vmatmul.mubr.f32.gmra.mrb[6].mxu1 %v1313_v51 }
 0x54c   : > { %v1983_v14 = vpop.f32.mrb[0].mxu0  ;;  %v1995_v16 = vpop.f32.mrb[0].mxu1 }
 0x54d   : > { %1460 = vst [vmem:[#allocation11 + $0x8] sm:$0xff] %v1983_v14  ;;  %1468 = vst [vmem:[#allocation11 + $0x48] sm:$0xff] %v1995_v16  ;;  %v1380_v19 = vpop.f32.mrb[1].mxu0  ;;  %v1420_v55 = vpop.f32.mrb[1].mxu1 }
 0x54e   : > { %1459 = vst [vmem:[#allocation11] sm:$0xff] %v1380_v19  ;;  %1467 = vst [vmem:[#allocation11 + $0x40] sm:$0xff] %v1420_v55 }
 0x550   : > { %v1986_v58 = vpop.f32.mrb[2].mxu0  ;;  %v1998_v27 = vpop.f32.mrb[2].mxu1 }
 0x551   : > { %1462 = vst [vmem:[#allocation11 + $0x18] sm:$0xff] %v1986_v58  ;;  %1470 = vst [vmem:[#allocation11 + $0x58] sm:$0xff] %v1998_v27  ;;  %v1390_v28 = vpop.f32.mrb[3].mxu0  ;;  %v1430_v59 = vpop.f32.mrb[3].mxu1 }
 0x552   : > { %1461 = vst [vmem:[#allocation11 + $0x10] sm:$0xff] %v1390_v28  ;;  %1469 = vst [vmem:[#allocation11 + $0x50] sm:$0xff] %v1430_v59 }
 0x554   : > { %v1989_v33 = vpop.f32.mrb[4].mxu0  ;;  %v2001_v44 = vpop.f32.mrb[4].mxu1 }
 0x555   : > { %1464 = vst [vmem:[#allocation11 + $0x28] sm:$0xff] %v1989_v33  ;;  %1472 = vst [vmem:[#allocation11 + $0x68] sm:$0xff] %v2001_v44  ;;  %v1400_v45 = vpop.f32.mrb[5].mxu0  ;;  %v1440_v62 = vpop.f32.mrb[5].mxu1 }
 0x556   : > { %1463 = vst [vmem:[#allocation11 + $0x20] sm:$0xff] %v1400_v45  ;;  %1471 = vst [vmem:[#allocation11 + $0x60] sm:$0xff] %v1440_v62 }
 0x558   : > { %v1992_v63 = vpop.f32.mrb[6].mxu0  ;;  %v2004_v35 = vpop.f32.mrb[6].mxu1 }
 0x559   : > { %1466 = vst [vmem:[#allocation11 + $0x38] sm:$0xff] %v1992_v63  ;;  %1474 = vst [vmem:[#allocation11 + $0x78] sm:$0xff] %v2004_v35  ;;  %v1410_v0 = vpop.f32.mrb[7].mxu0  ;;  %v1450_v1 = vpop.f32.mrb[7].mxu1 }
 0x55a   : > { %1465 = vst [vmem:[#allocation11 + $0x30] sm:$0xff] %v1410_v0  ;;  %1473 = vst [vmem:[#allocation11 + $0x70] sm:$0xff] %v1450_v1 }
 0x55b PF: > { %p2172_p10 = scmp.eq.s32.totalorder %s2663_s18, 2  ;;  %s2486_s24 = smov [#allocation11]  }
 0x55c   : > { %s1491_s15 = sshll.u32 %s2486_s24, 4  ;;  %s1492_s15 = int_to_ptr.vmem [resolvable:$true] %s1491_s15 }
 0x55d   : > { %s2388_s29 = scalar_lea.vmem %s1492_s15, 2048  ;;  %s2394_s30 = scalar_lea.vmem %s1492_s15, 4096 }
 0x55e   : > { %p2389_p5 = scmp.ne.s32.totalorder %s1492_s15, %s2388_s29  ;;  %p2395_p0 = scmp.lt.s32.totalorder %s1492_s15, %s1492_s15 }
 0x55f   : > { %p2396_p9 = scmp.lt.s32.totalorder %s2394_s30, %s2388_s29 }
 0x560   : > { %p2390_p7 = pnand %p2389_p5, %p2172_p10 }
 0x561   : > { %p2397_p3 = por %p2396_p9, %p2395_p0 }
 0x562   : > { %p2391_p4 = pneg %p2390_p7 }
 0x564   : > { %p2398_p2 = pnand %p2397_p3, %p2391_p4 }
 0x566   : > { %2401 = shalt.err (!%p2398_p2)
}
 0x567   : > { %s2402_s20 = scalar_lea.hbm %s3021_s6, 2048 }
 0x568   : > { %p2403_p8 = scmp.ne.s32.totalorder %s3021_s6, %s2402_s20  ;;  %p2408_p1 = scmp.lt.u32.totalorder %s2402_s20, %s3021_s6 }
 0x56a   : > { %p2404_p11 = pnand %p2403_p8, %p2172_p10 }
 0x56c   : > { %p2405_p13 = pneg %p2404_p11 }
 0x56e   : > { %p2410_p12 = pnand %p2408_p1, %p2405_p13 }
 0x570   : > { %2413 = shalt.err (!%p2410_p12)
}
 0x571   : > { %s2487_s11 = smov 128   ;;  %s2488_s10 = smov 8  }
 0x572   : > { %2146 = dma.vmem_to_hbm [thread:$0]  (%p2172_p10), %s1492_s15, 2048, %s3021_s6, [#allocation6], %s2487_s11, %s2487_s11, %s2488_s10  }
 0x573 PF: > { %p2173_p6 = scmp.ge.s32.totalorder %s2476_s26, 2  ;;  %s3046_s27 = sadd.s32 4294967294, %s2476_s26  }
 0x574   : > { %p2174_p5 = scmp.eq.s32.totalorder %s3046_s27, 2 }
 0x576   : > { %p2164_p7 = pnand %p2174_p5, %p2173_p6 }
 0x578   : > { %2451 = dma.done.wait (!%p2164_p7), [#allocation6], 2048  }
 0x579   : > { %2453 = vsyncadd (!%p2164_p7), [#allocation6], 4294965248  ;;  %s23_s26 = sadd.s32 1, %s2476_s26   ;;  %s3047_s21 = smov %s2460_s22 }
 0x57a   : > { %p20_p4 = scmp.ge.s32.totalorder %s23_s26, 5   ;;  %s3048_s22 = smov %s2464_s23 }
 0x57b   : > { %s3049_s23 = smov %s2660_s19  ;;  %s3050_s24 = smov %s2472_s25 }
 0x57c   : > { %s3051_s25 = smov %s3053_s12  ;;  %22 = sbr.rel (!%p20_p4) target bundleno = 9 (0x9), region = 144 }
 0x583   :  { %1512 = vsyncpa [#allocation5], 1 }
 0x584   :  { %1514 = vsyncpa [#allocation5 + $0x1], 1 }
 0x585   :  { %1515 = vsyncpa [#allocation8], 1 }
 0x586   :  { %1516 = vsyncpa [#allocation6], 1 }
 0x587   :  { %1518 = vsyncpa [#allocation6 + $0x1], 1 }

</bundles_post_ra>
